<compile_context>
chip_gen: v5e
topology: v5e:2x2
jax: 0.10.0
libtpu: 0.0.40
codegen_flags: <defaults>
</compile_context>

<pallas_src>
import functools

import jax
import jax.numpy as jnp
from jax import lax
from jax.experimental import pallas as pl
from jax.experimental.pallas import tpu as pltpu

BN_EPS = 1e-5
# 3x3 taps in PyTorch (kh, kw) row-major order -> (dh, dw) offsets.
TAPS = tuple((dh, dw) for dh in (-1, 0, 1) for dw in (-1, 0, 1))


def _conv3x3_kernel(x_ref, scale_ref, off_ref, w_ref, b_ref, y_ref, stat_ref,
                    *, H, W, pre_bn_relu):
    """Per-image: [optional fused BN+ReLU of the previous stage] -> 3x3 conv
    (stride 1, zero pad 1) -> per-channel partial sums for the next BN.

    x_ref:     (1, C_in, H*W)    channels on sublanes, flat spatial on lanes
    scale_ref: (C_in, 1)         folded BN scale of previous stage (unused if !pre_bn_relu)
    off_ref:   (C_in, 1)         folded BN offset of previous stage
    w_ref:     (9, C_out, C_in)  conv taps, k = (dh+1)*3 + (dw+1)
    b_ref:     (C_out, 1)        conv bias
    y_ref:     (1, C_out, H*W)   conv output (pre-BN)
    stat_ref:  (1, C_out, 2)     per-image per-channel [sum(y), sum(y*y)]
    """
    HW = H * W
    P = W + 1                                   # one flat row of zero padding + 1

    x = x_ref[0]                                # (C_in, HW) f32
    if pre_bn_relu:
        # Fused BatchNorm + ReLU of the previous stage (per-channel affine).
        x = jnp.maximum(x * scale_ref[...] + off_ref[...], 0.0)

    c_in = x.shape[0]
    c_out = w_ref.shape[1]

    # Zero-pad the flattened spatial axis inside VMEM so every 3x3 tap is a
    # static slice (row out-of-bounds handled by the zero pad).
    zpad = jnp.zeros((c_in, P), jnp.float32)
    x_p = jnp.concatenate([zpad, x, zpad], axis=-1)          # (C_in, HW + 2P)

    # Column-validity masks.  Row-OOB reads land in the zero padding; the only
    # remaining leaks (across a row boundary) are exactly the column-invalid
    # positions, so masking dw = +/-1 columns is sufficient.
    w_idx = lax.broadcasted_iota(jnp.int32, (1, HW), 1) % W
    ok_left = w_idx >= 1                                     # valid for dw == -1
    ok_right = w_idx <= W - 2                                # valid for dw == +1

    acc = jnp.zeros((c_out, HW), jnp.float32) + b_ref[...]   # start from the bias
    for k, (dh, dw) in enumerate(TAPS):
        off = dh * W + dw
        xs = x_p[:, P + off: P + off + HW]                   # (C_in, HW) shifted view
        if dw == -1:
            xs = jnp.where(ok_left, xs, 0.0)
        elif dw == 1:
            xs = jnp.where(ok_right, xs, 0.0)
        acc = acc + jnp.dot(w_ref[k], xs, preferred_element_type=jnp.float32)

    y_ref[0] = acc
    # Per-channel partial sums for the batch-norm statistics (reduced over N in JAX).
    s1 = jnp.sum(acc, axis=-1, keepdims=True)                # (C_out, 1)
    s2 = jnp.sum(acc * acc, axis=-1, keepdims=True)          # (C_out, 1)
    stat_ref[0] = jnp.concatenate([s1, s2], axis=-1)         # (C_out, 2)


def _bn_relu_kernel(y_ref, scale_ref, off_ref, o_ref):
    # y_ref/o_ref: (1, C, H*W); scale/off: (C, 1)
    o_ref[0] = jnp.maximum(y_ref[0] * scale_ref[...] + off_ref[...], 0.0)


_COMPILER_PARAMS = pltpu.CompilerParams(
    dimension_semantics=("parallel",),
    vmem_limit_bytes=32 * 1024 * 1024,
)


def _conv_stage(x_flat, scale_in, off_in, w_taps, b_col, *, H, W, pre_bn_relu):
    """One conv stage over the whole batch.  Returns (conv_out, partial_stats)."""
    N, C_in, HW = x_flat.shape
    _, C_out, _ = w_taps.shape
    kern = functools.partial(_conv3x3_kernel, H=H, W=W, pre_bn_relu=pre_bn_relu)
    cost = pl.CostEstimate(
        flops=2 * 9 * C_in * C_out * HW * N,
        transcendentals=0,
        bytes_accessed=4 * N * HW * (C_in + C_out) + 4 * N * C_out * 2,
    )
    return pl.pallas_call(
        kern,
        out_shape=(
            jax.ShapeDtypeStruct((N, C_out, HW), jnp.float32),
            jax.ShapeDtypeStruct((N, C_out, 2), jnp.float32),
        ),
        grid=(N,),
        in_specs=[
            pl.BlockSpec((1, C_in, HW), lambda n: (n, 0, 0)),
            pl.BlockSpec((C_in, 1), lambda n: (0, 0)),
            pl.BlockSpec((C_in, 1), lambda n: (0, 0)),
            pl.BlockSpec((9, C_out, C_in), lambda n: (0, 0, 0)),
            pl.BlockSpec((C_out, 1), lambda n: (0, 0)),
        ],
        out_specs=(
            pl.BlockSpec((1, C_out, HW), lambda n: (n, 0, 0)),
            pl.BlockSpec((1, C_out, 2), lambda n: (n, 0, 0)),
        ),
        compiler_params=_COMPILER_PARAMS,
        cost_estimate=cost,
    )(x_flat, scale_in, off_in, w_taps, b_col)


def _bn_fold(stats, count, gamma, beta):
    """Reduce per-image partial sums -> folded per-channel (scale, offset)."""
    tot = jnp.sum(stats, axis=0)                              # (C, 2)
    mean = tot[:, 0] / count
    var = jnp.maximum(tot[:, 1] / count - mean * mean, 0.0)   # biased batch variance
    scale = gamma * lax.rsqrt(var + BN_EPS)
    offset = beta - mean * scale
    return (scale.reshape(-1, 1).astype(jnp.float32),
            offset.reshape(-1, 1).astype(jnp.float32))


def double_conv_forward(x, w1, b1, g1, be1, w2, b2, g2, be2):
    """x: (N, C_in, H, W) f32; conv weights in PyTorch OIHW layout; returns NCHW."""
    N, C_in, H, W = x.shape
    C_mid = w1.shape[0]
    C_out = w2.shape[0]
    HW = H * W

    # Free reshape of NCHW (no transpose, no copy of the activation).
    x_flat = x.reshape(N, C_in, HW).astype(jnp.float32)
    # Tiny weight re-layouts (9*C*C elements, negligible).
    w1_t = jnp.transpose(w1, (2, 3, 0, 1)).reshape(9, C_mid, C_in).astype(jnp.float32)
    w2_t = jnp.transpose(w2, (2, 3, 0, 1)).reshape(9, C_out, C_mid).astype(jnp.float32)

    ones_in = jnp.ones((C_in, 1), jnp.float32)
    zeros_in = jnp.zeros((C_in, 1), jnp.float32)

    # Stage 1: conv1 + BN1 partial statistics.
    y1, st1 = _conv_stage(x_flat, ones_in, zeros_in, w1_t,
                          b1.reshape(-1, 1).astype(jnp.float32),
                          H=H, W=W, pre_bn_relu=False)
    s1, o1 = _bn_fold(st1, N * HW, g1.astype(jnp.float32), be1.astype(jnp.float32))

    # Stage 2: fused BN1+ReLU1 -> conv2 + BN2 partial statistics.
    y2, st2 = _conv_stage(y1, s1, o1, w2_t,
                          b2.reshape(-1, 1).astype(jnp.float32),
                          H=H, W=W, pre_bn_relu=True)
    s2, o2 = _bn_fold(st2, N * HW, g2.astype(jnp.float32), be2.astype(jnp.float32))

    # Stage 3: BN2 + ReLU2 (elementwise, lane-dense blocks).
    out_flat = pl.pallas_call(
        _bn_relu_kernel,
        out_shape=jax.ShapeDtypeStruct((N, C_out, HW), jnp.float32),
        grid=(N,),
        in_specs=[
            pl.BlockSpec((1, C_out, HW), lambda n: (n, 0, 0)),
            pl.BlockSpec((C_out, 1), lambda n: (0, 0)),
            pl.BlockSpec((C_out, 1), lambda n: (0, 0)),
        ],
        out_specs=pl.BlockSpec((1, C_out, HW), lambda n: (n, 0, 0)),
        compiler_params=_COMPILER_PARAMS,
        cost_estimate=pl.CostEstimate(
            flops=3 * N * C_out * HW, transcendentals=0,
            bytes_accessed=2 * 4 * N * C_out * HW),
    )(y2, s2, o2)

    return out_flat.reshape(N, C_out, H, W)   # free reshape back to NCHW


def _ref_forward(x, w1, b1, g1, be1, w2, b2, g2, be2):
    """Pure-JAX reference with the same semantics as the PyTorch forward (train mode)."""
    def conv(h, w, b):
        y = lax.conv_general_dilated(h, w, (1, 1), ((1, 1), (1, 1)),
                                     dimension_numbers=("NCHW", "OIHW", "NCHW"))
        return y + b[None, :, None, None]

    def bn_relu(y, g, be):
        mean = jnp.mean(y, axis=(0, 2, 3), keepdims=True)
        var = jnp.mean((y - mean) ** 2, axis=(0, 2, 3), keepdims=True)
        yh = (y - mean) / jnp.sqrt(var + BN_EPS)
        return jnp.maximum(yh * g[None, :, None, None] + be[None, :, None, None], 0.0)

    h = bn_relu(conv(x, w1, b1), g1, be1)
    return bn_relu(conv(h, w2, b2), g2, be2)


if __name__ == "__main__":
    key = jax.random.PRNGKey(0)
    ks = jax.random.split(key, 8)

    N, C_in, C_out, H, W = 2, 4, 8, 16, 16
    x = jax.random.normal(ks[0], (N, C_in, H, W), jnp.float32)

    # Deterministic synthetic parameters (PyTorch layouts).
    w1 = jax.random.normal(ks[1], (C_out, C_in, 3, 3), jnp.float32) / (3.0 * C_in ** 0.5)
    b1 = 0.1 * jax.random.normal(ks[2], (C_out,), jnp.float32)
    g1 = 1.0 + 0.1 * jax.random.normal(ks[3], (C_out,), jnp.float32)
    be1 = 0.1 * jax.random.normal(ks[4], (C_out,), jnp.float32)
    w2 = jax.random.normal(ks[5], (C_out, C_out, 3, 3), jnp.float32) / (3.0 * C_out ** 0.5)
    b2 = 0.1 * jax.random.normal(ks[6], (C_out,), jnp.float32)
    g2 = 1.0 + 0.1 * jax.random.normal(ks[7], (C_out,), jnp.float32)
    be2 = 0.05 * jnp.ones((C_out,), jnp.float32)

    fwd = jax.jit(double_conv_forward)
    out = jax.block_until_ready(fwd(x, w1, b1, g1, be1, w2, b2, g2, be2))

    ref = _ref_forward(x, w1, b1, g1, be1, w2, b2, g2, be2)
    assert out.shape == (N, C_out, H, W) and out.dtype == jnp.float32
    err = float(jnp.max(jnp.abs(out - ref)))
    assert jnp.allclose(out, ref, atol=2e-4, rtol=2e-4), f"max abs err {err}"
    print("KERNEL_OK")
</pallas_src>

<mosaic_0001>
module attributes {stable_mosaic.version = 11 : i64} {
  func.func @_conv3x3_kernel(%arg0: i32, %arg1: memref<1x4x256xf32, #tpu.memory_space<vmem>>, %arg2: memref<4x1xf32, #tpu.memory_space<vmem>>, %arg3: memref<4x1xf32, #tpu.memory_space<vmem>>, %arg4: memref<9x8x4xf32, #tpu.memory_space<vmem>>, %arg5: memref<8x1xf32, #tpu.memory_space<vmem>>, %arg6: memref<1x8x256xf32, #tpu.memory_space<vmem>>, %arg7: memref<1x8x2xf32, #tpu.memory_space<vmem>>) attributes {dimension_semantics = [#tpu.dimension_semantics<parallel>], iteration_bounds = array<i64: 2>, scalar_prefetch = 0 : i64, scratch_operands = 0 : i64, tpu.core_type = #tpu.core_type<tc>, window_params = [{transform_indices = @transform_0, window_bounds = array<i64: 1, 4, 256>}, {pipeline_mode = #tpu.pipeline_mode<synchronous>, transform_indices = @transform_1, window_bounds = array<i64: 4, 1>}, {pipeline_mode = #tpu.pipeline_mode<synchronous>, transform_indices = @transform_2, window_bounds = array<i64: 4, 1>}, {pipeline_mode = #tpu.pipeline_mode<synchronous>, transform_indices = @transform_3, window_bounds = array<i64: 9, 8, 4>}, {pipeline_mode = #tpu.pipeline_mode<synchronous>, transform_indices = @transform_4, window_bounds = array<i64: 8, 1>}, {transform_indices = @transform_5, window_bounds = array<i64: 1, 8, 256>}, {transform_indices = @transform_6, window_bounds = array<i64: 1, 8, 2>}]} {
    %c0 = arith.constant 0 : index
    %c0_0 = arith.constant 0 : index
    %c0_1 = arith.constant 0 : index
    %0 = vector.load %arg1[%c0, %c0_0, %c0_1] : memref<1x4x256xf32, #tpu.memory_space<vmem>>, vector<1x4x256xf32>
    %1 = vector.shape_cast %0 : vector<1x4x256xf32> to vector<4x256xf32>
    %cst = arith.constant 0.000000e+00 : f32
    %2 = vector.broadcast %cst : f32 to vector<4x17xf32>
    %3 = tpu.concatenate %2, %1, %2 in 1 : vector<4x17xf32>, vector<4x256xf32>, vector<4x17xf32> -> vector<4x290xf32>
    %4 = tpu.iota {dimensions = array<i32: 1>} : vector<1x256xi32>
    %c16_i32 = arith.constant 16 : i32
    %c0_i32 = arith.constant 0 : i32
    %5 = arith.cmpi eq, %c16_i32, %c0_i32 : i32
    %c1_i32 = arith.constant 1 : i32
    %6 = arith.select %5, %c1_i32, %c16_i32 : i32
    %7 = vector.broadcast %6 : i32 to vector<1x256xi32>
    %8 = arith.remsi %4, %7 : vector<1x256xi32>
    %c0_i32_2 = arith.constant 0 : i32
    %9 = vector.broadcast %c0_i32_2 : i32 to vector<1x256xi32>
    %10 = arith.cmpi ne, %8, %9 : vector<1x256xi32>
    %c0_i32_3 = arith.constant 0 : i32
    %11 = vector.broadcast %c0_i32_3 : i32 to vector<1x256xi32>
    %12 = arith.cmpi slt, %8, %11 : vector<1x256xi32>
    %c0_i32_4 = arith.constant 0 : i32
    %13 = arith.cmpi slt, %6, %c0_i32_4 : i32
    %14 = vector.broadcast %13 : i1 to vector<1x256xi1>
    %15 = vector.broadcast %14 : vector<1x256xi1> to vector<1x256xi1>
    %16 = arith.xori %12, %15 : vector<1x256xi1>
    %17 = arith.andi %16, %10 : vector<1x256xi1>
    %18 = vector.broadcast %6 : i32 to vector<1x256xi32>
    %19 = arith.addi %8, %18 : vector<1x256xi32>
    %20 = arith.select %17, %19, %8 : vector<1x256xi1>, vector<1x256xi32>
    %c1_i32_5 = arith.constant 1 : i32
    %21 = vector.broadcast %c1_i32_5 : i32 to vector<1x256xi32>
    %22 = arith.cmpi sge, %20, %21 : vector<1x256xi32>
    %c14_i32 = arith.constant 14 : i32
    %23 = vector.broadcast %c14_i32 : i32 to vector<1x256xi32>
    %24 = arith.cmpi sle, %20, %23 : vector<1x256xi32>
    %cst_6 = arith.constant 0.000000e+00 : f32
    %25 = vector.broadcast %cst_6 : f32 to vector<8x256xf32>
    %c0_7 = arith.constant 0 : index
    %c0_8 = arith.constant 0 : index
    %26 = vector.load %arg5[%c0_7, %c0_8] : memref<8x1xf32, #tpu.memory_space<vmem>>, vector<8x1xf32>
    %27 = vector.broadcast %26 : vector<8x1xf32> to vector<8x256xf32>
    %28 = arith.addf %25, %27 : vector<8x256xf32>
    %29 = vector.extract_strided_slice %3 {offsets = [0, 0], sizes = [4, 256], strides = [1, 1]} : vector<4x290xf32> to vector<4x256xf32>
    %cst_9 = arith.constant 0.000000e+00 : f32
    %30 = vector.shape_cast %22 : vector<1x256xi1> to vector<1x256xi1>
    %31 = vector.broadcast %30 : vector<1x256xi1> to vector<4x256xi1>
    %32 = vector.broadcast %cst_9 : f32 to vector<4x256xf32>
    %33 = arith.select %31, %29, %32 : vector<4x256xi1>, vector<4x256xf32>
    %c0_10 = arith.constant 0 : index
    %c0_11 = arith.constant 0 : index
    %c0_12 = arith.constant 0 : index
    %34 = vector.load %arg4[%c0_10, %c0_11, %c0_12] : memref<9x8x4xf32, #tpu.memory_space<vmem>>, vector<1x8x4xf32>
    %35 = vector.shape_cast %34 : vector<1x8x4xf32> to vector<8x4xf32>
    %cst_13 = arith.constant dense<0.000000e+00> : vector<8x256xf32>
    %36 = tpu.matmul %35, %33, %cst_13 {dimension_numbers = #tpu.dot_dimension_numbers<[1], [0], [0], [1], [0, 0, 1, 1], [], []>} : vector<8x4xf32>, vector<4x256xf32>, vector<8x256xf32> -> vector<8x256xf32>
    %37 = arith.addf %28, %36 : vector<8x256xf32>
    %38 = vector.extract_strided_slice %3 {offsets = [0, 1], sizes = [4, 256], strides = [1, 1]} : vector<4x290xf32> to vector<4x256xf32>
    %c1 = arith.constant 1 : index
    %c0_14 = arith.constant 0 : index
    %c0_15 = arith.constant 0 : index
    %39 = vector.load %arg4[%c1, %c0_14, %c0_15] : memref<9x8x4xf32, #tpu.memory_space<vmem>>, vector<1x8x4xf32>
    %40 = vector.shape_cast %39 : vector<1x8x4xf32> to vector<8x4xf32>
    %cst_16 = arith.constant dense<0.000000e+00> : vector<8x256xf32>
    %41 = tpu.matmul %40, %38, %cst_16 {dimension_numbers = #tpu.dot_dimension_numbers<[1], [0], [0], [1], [0, 0, 1, 1], [], []>} : vector<8x4xf32>, vector<4x256xf32>, vector<8x256xf32> -> vector<8x256xf32>
    %42 = arith.addf %37, %41 : vector<8x256xf32>
    %43 = vector.extract_strided_slice %3 {offsets = [0, 2], sizes = [4, 256], strides = [1, 1]} : vector<4x290xf32> to vector<4x256xf32>
    %cst_17 = arith.constant 0.000000e+00 : f32
    %44 = vector.shape_cast %24 : vector<1x256xi1> to vector<1x256xi1>
    %45 = vector.broadcast %44 : vector<1x256xi1> to vector<4x256xi1>
    %46 = vector.broadcast %cst_17 : f32 to vector<4x256xf32>
    %47 = arith.select %45, %43, %46 : vector<4x256xi1>, vector<4x256xf32>
    %c2 = arith.constant 2 : index
    %c0_18 = arith.constant 0 : index
    %c0_19 = arith.constant 0 : index
    %48 = vector.load %arg4[%c2, %c0_18, %c0_19] : memref<9x8x4xf32, #tpu.memory_space<vmem>>, vector<1x8x4xf32>
    %49 = vector.shape_cast %48 : vector<1x8x4xf32> to vector<8x4xf32>
    %cst_20 = arith.constant dense<0.000000e+00> : vector<8x256xf32>
    %50 = tpu.matmul %49, %47, %cst_20 {dimension_numbers = #tpu.dot_dimension_numbers<[1], [0], [0], [1], [0, 0, 1, 1], [], []>} : vector<8x4xf32>, vector<4x256xf32>, vector<8x256xf32> -> vector<8x256xf32>
    %51 = arith.addf %42, %50 : vector<8x256xf32>
    %52 = vector.extract_strided_slice %3 {offsets = [0, 16], sizes = [4, 256], strides = [1, 1]} : vector<4x290xf32> to vector<4x256xf32>
    %cst_21 = arith.constant 0.000000e+00 : f32
    %53 = vector.shape_cast %22 : vector<1x256xi1> to vector<1x256xi1>
    %54 = vector.broadcast %53 : vector<1x256xi1> to vector<4x256xi1>
    %55 = vector.broadcast %cst_21 : f32 to vector<4x256xf32>
    %56 = arith.select %54, %52, %55 : vector<4x256xi1>, vector<4x256xf32>
    %c3 = arith.constant 3 : index
    %c0_22 = arith.constant 0 : index
    %c0_23 = arith.constant 0 : index
    %57 = vector.load %arg4[%c3, %c0_22, %c0_23] : memref<9x8x4xf32, #tpu.memory_space<vmem>>, vector<1x8x4xf32>
    %58 = vector.shape_cast %57 : vector<1x8x4xf32> to vector<8x4xf32>
    %cst_24 = arith.constant dense<0.000000e+00> : vector<8x256xf32>
    %59 = tpu.matmul %58, %56, %cst_24 {dimension_numbers = #tpu.dot_dimension_numbers<[1], [0], [0], [1], [0, 0, 1, 1], [], []>} : vector<8x4xf32>, vector<4x256xf32>, vector<8x256xf32> -> vector<8x256xf32>
    %60 = arith.addf %51, %59 : vector<8x256xf32>
    %61 = vector.extract_strided_slice %3 {offsets = [0, 17], sizes = [4, 256], strides = [1, 1]} : vector<4x290xf32> to vector<4x256xf32>
    %c4 = arith.constant 4 : index
    %c0_25 = arith.constant 0 : index
    %c0_26 = arith.constant 0 : index
    %62 = vector.load %arg4[%c4, %c0_25, %c0_26] : memref<9x8x4xf32, #tpu.memory_space<vmem>>, vector<1x8x4xf32>
    %63 = vector.shape_cast %62 : vector<1x8x4xf32> to vector<8x4xf32>
    %cst_27 = arith.constant dense<0.000000e+00> : vector<8x256xf32>
    %64 = tpu.matmul %63, %61, %cst_27 {dimension_numbers = #tpu.dot_dimension_numbers<[1], [0], [0], [1], [0, 0, 1, 1], [], []>} : vector<8x4xf32>, vector<4x256xf32>, vector<8x256xf32> -> vector<8x256xf32>
    %65 = arith.addf %60, %64 : vector<8x256xf32>
    %66 = vector.extract_strided_slice %3 {offsets = [0, 18], sizes = [4, 256], strides = [1, 1]} : vector<4x290xf32> to vector<4x256xf32>
    %cst_28 = arith.constant 0.000000e+00 : f32
    %67 = vector.shape_cast %24 : vector<1x256xi1> to vector<1x256xi1>
    %68 = vector.broadcast %67 : vector<1x256xi1> to vector<4x256xi1>
    %69 = vector.broadcast %cst_28 : f32 to vector<4x256xf32>
    %70 = arith.select %68, %66, %69 : vector<4x256xi1>, vector<4x256xf32>
    %c5 = arith.constant 5 : index
    %c0_29 = arith.constant 0 : index
    %c0_30 = arith.constant 0 : index
    %71 = vector.load %arg4[%c5, %c0_29, %c0_30] : memref<9x8x4xf32, #tpu.memory_space<vmem>>, vector<1x8x4xf32>
    %72 = vector.shape_cast %71 : vector<1x8x4xf32> to vector<8x4xf32>
    %cst_31 = arith.constant dense<0.000000e+00> : vector<8x256xf32>
    %73 = tpu.matmul %72, %70, %cst_31 {dimension_numbers = #tpu.dot_dimension_numbers<[1], [0], [0], [1], [0, 0, 1, 1], [], []>} : vector<8x4xf32>, vector<4x256xf32>, vector<8x256xf32> -> vector<8x256xf32>
    %74 = arith.addf %65, %73 : vector<8x256xf32>
    %75 = vector.extract_strided_slice %3 {offsets = [0, 32], sizes = [4, 256], strides = [1, 1]} : vector<4x290xf32> to vector<4x256xf32>
    %cst_32 = arith.constant 0.000000e+00 : f32
    %76 = vector.shape_cast %22 : vector<1x256xi1> to vector<1x256xi1>
    %77 = vector.broadcast %76 : vector<1x256xi1> to vector<4x256xi1>
    %78 = vector.broadcast %cst_32 : f32 to vector<4x256xf32>
    %79 = arith.select %77, %75, %78 : vector<4x256xi1>, vector<4x256xf32>
    %c6 = arith.constant 6 : index
    %c0_33 = arith.constant 0 : index
    %c0_34 = arith.constant 0 : index
    %80 = vector.load %arg4[%c6, %c0_33, %c0_34] : memref<9x8x4xf32, #tpu.memory_space<vmem>>, vector<1x8x4xf32>
    %81 = vector.shape_cast %80 : vector<1x8x4xf32> to vector<8x4xf32>
    %cst_35 = arith.constant dense<0.000000e+00> : vector<8x256xf32>
    %82 = tpu.matmul %81, %79, %cst_35 {dimension_numbers = #tpu.dot_dimension_numbers<[1], [0], [0], [1], [0, 0, 1, 1], [], []>} : vector<8x4xf32>, vector<4x256xf32>, vector<8x256xf32> -> vector<8x256xf32>
    %83 = arith.addf %74, %82 : vector<8x256xf32>
    %84 = vector.extract_strided_slice %3 {offsets = [0, 33], sizes = [4, 256], strides = [1, 1]} : vector<4x290xf32> to vector<4x256xf32>
    %c7 = arith.constant 7 : index
    %c0_36 = arith.constant 0 : index
    %c0_37 = arith.constant 0 : index
    %85 = vector.load %arg4[%c7, %c0_36, %c0_37] : memref<9x8x4xf32, #tpu.memory_space<vmem>>, vector<1x8x4xf32>
    %86 = vector.shape_cast %85 : vector<1x8x4xf32> to vector<8x4xf32>
    %cst_38 = arith.constant dense<0.000000e+00> : vector<8x256xf32>
    %87 = tpu.matmul %86, %84, %cst_38 {dimension_numbers = #tpu.dot_dimension_numbers<[1], [0], [0], [1], [0, 0, 1, 1], [], []>} : vector<8x4xf32>, vector<4x256xf32>, vector<8x256xf32> -> vector<8x256xf32>
    %88 = arith.addf %83, %87 : vector<8x256xf32>
    %89 = vector.extract_strided_slice %3 {offsets = [0, 34], sizes = [4, 256], strides = [1, 1]} : vector<4x290xf32> to vector<4x256xf32>
    %cst_39 = arith.constant 0.000000e+00 : f32
    %90 = vector.shape_cast %24 : vector<1x256xi1> to vector<1x256xi1>
    %91 = vector.broadcast %90 : vector<1x256xi1> to vector<4x256xi1>
    %92 = vector.broadcast %cst_39 : f32 to vector<4x256xf32>
    %93 = arith.select %91, %89, %92 : vector<4x256xi1>, vector<4x256xf32>
    %c8 = arith.constant 8 : index
    %c0_40 = arith.constant 0 : index
    %c0_41 = arith.constant 0 : index
    %94 = vector.load %arg4[%c8, %c0_40, %c0_41] : memref<9x8x4xf32, #tpu.memory_space<vmem>>, vector<1x8x4xf32>
    %95 = vector.shape_cast %94 : vector<1x8x4xf32> to vector<8x4xf32>
    %cst_42 = arith.constant dense<0.000000e+00> : vector<8x256xf32>
    %96 = tpu.matmul %95, %93, %cst_42 {dimension_numbers = #tpu.dot_dimension_numbers<[1], [0], [0], [1], [0, 0, 1, 1], [], []>} : vector<8x4xf32>, vector<4x256xf32>, vector<8x256xf32> -> vector<8x256xf32>
    %97 = arith.addf %88, %96 : vector<8x256xf32>
    %c0_43 = arith.constant 0 : index
    %c0_44 = arith.constant 0 : index
    %c0_45 = arith.constant 0 : index
    %98 = vector.load %arg6[%c0_43, %c0_44, %c0_45] : memref<1x8x256xf32, #tpu.memory_space<vmem>>, vector<1x8x256xf32>
    %99 = vector.shape_cast %98 : vector<1x8x256xf32> to vector<8x256xf32>
    %100 = vector.shape_cast %97 : vector<8x256xf32> to vector<1x8x256xf32>
    tpu.vector_store %arg6[%c0_43, %c0_44, %c0_45], %100 {strides = array<i32>} : memref<1x8x256xf32, #tpu.memory_space<vmem>>, vector<1x8x256xf32>,
    %cst_46 = arith.constant dense<0.000000e+00> : vector<8xf32>
    %101 = vector.multi_reduction <add>, %97, %cst_46 [1] : vector<8x256xf32> to vector<8xf32>
    %102 = vector.shape_cast %101 : vector<8xf32> to vector<8x1xf32>
    %103 = arith.mulf %97, %97 : vector<8x256xf32>
    %cst_47 = arith.constant dense<0.000000e+00> : vector<8xf32>
    %104 = vector.multi_reduction <add>, %103, %cst_47 [1] : vector<8x256xf32> to vector<8xf32>
    %105 = vector.shape_cast %104 : vector<8xf32> to vector<8x1xf32>
    %106 = tpu.concatenate %102, %105 in 1 : vector<8x1xf32>, vector<8x1xf32> -> vector<8x2xf32>
    %c0_48 = arith.constant 0 : index
    %c0_49 = arith.constant 0 : index
    %c0_50 = arith.constant 0 : index
    %107 = vector.load %arg7[%c0_48, %c0_49, %c0_50] : memref<1x8x2xf32, #tpu.memory_space<vmem>>, vector<1x8x2xf32>
    %108 = vector.shape_cast %107 : vector<1x8x2xf32> to vector<8x2xf32>
    %109 = vector.shape_cast %106 : vector<8x2xf32> to vector<1x8x2xf32>
    tpu.vector_store %arg7[%c0_48, %c0_49, %c0_50], %109 {strides = array<i32>} : memref<1x8x2xf32, #tpu.memory_space<vmem>>, vector<1x8x2xf32>,
    return
  }
  func.func @transform_0(%arg0: i32) -> (i32, i32, i32) {
    %c0_i32 = arith.constant 0 : i32
    %c0_i32_0 = arith.constant 0 : i32
    %c0_i32_1 = arith.constant 0 : i32
    return %arg0, %c0_i32, %c0_i32_0 : i32, i32, i32
  }
  func.func @transform_1(%arg0: i32) -> (i32, i32) {
    %c0_i32 = arith.constant 0 : i32
    %c0_i32_0 = arith.constant 0 : i32
    %c0_i32_1 = arith.constant 0 : i32
    return %c0_i32, %c0_i32_0 : i32, i32
  }
  func.func @transform_2(%arg0: i32) -> (i32, i32) {
    %c0_i32 = arith.constant 0 : i32
    %c0_i32_0 = arith.constant 0 : i32
    %c0_i32_1 = arith.constant 0 : i32
    return %c0_i32, %c0_i32_0 : i32, i32
  }
  func.func @transform_3(%arg0: i32) -> (i32, i32, i32) {
    %c0_i32 = arith.constant 0 : i32
    %c0_i32_0 = arith.constant 0 : i32
    %c0_i32_1 = arith.constant 0 : i32
    %c0_i32_2 = arith.constant 0 : i32
    return %c0_i32, %c0_i32_0, %c0_i32_1 : i32, i32, i32
  }
  func.func @transform_4(%arg0: i32) -> (i32, i32) {
    %c0_i32 = arith.constant 0 : i32
    %c0_i32_0 = arith.constant 0 : i32
    %c0_i32_1 = arith.constant 0 : i32
    return %c0_i32, %c0_i32_0 : i32, i32
  }
  func.func @transform_5(%arg0: i32) -> (i32, i32, i32) {
    %c0_i32 = arith.constant 0 : i32
    %c0_i32_0 = arith.constant 0 : i32
    %c0_i32_1 = arith.constant 0 : i32
    return %arg0, %c0_i32, %c0_i32_0 : i32, i32, i32
  }
  func.func @transform_6(%arg0: i32) -> (i32, i32, i32) {
    %c0_i32 = arith.constant 0 : i32
    %c0_i32_0 = arith.constant 0 : i32
    %c0_i32_1 = arith.constant 0 : i32
    return %arg0, %c0_i32, %c0_i32_0 : i32, i32, i32
  }
}

module attributes {stable_mosaic.version = 11 : i64} {
  func.func @_bn_relu_kernel(%arg0: i32, %arg1: memref<1x8x256xf32, #tpu.memory_space<vmem>>, %arg2: memref<8x1xf32, #tpu.memory_space<vmem>>, %arg3: memref<8x1xf32, #tpu.memory_space<vmem>>, %arg4: memref<1x8x256xf32, #tpu.memory_space<vmem>>) attributes {dimension_semantics = [#tpu.dimension_semantics<parallel>], iteration_bounds = array<i64: 2>, scalar_prefetch = 0 : i64, scratch_operands = 0 : i64, tpu.core_type = #tpu.core_type<tc>, window_params = [{transform_indices = @transform_0, window_bounds = array<i64: 1, 8, 256>}, {pipeline_mode = #tpu.pipeline_mode<synchronous>, transform_indices = @transform_1, window_bounds = array<i64: 8, 1>}, {pipeline_mode = #tpu.pipeline_mode<synchronous>, transform_indices = @transform_2, window_bounds = array<i64: 8, 1>}, {transform_indices = @transform_3, window_bounds = array<i64: 1, 8, 256>}]} {
    %c0 = arith.constant 0 : index
    %c0_0 = arith.constant 0 : index
    %c0_1 = arith.constant 0 : index
    %0 = vector.load %arg1[%c0, %c0_0, %c0_1] : memref<1x8x256xf32, #tpu.memory_space<vmem>>, vector<1x8x256xf32>
    %1 = vector.shape_cast %0 : vector<1x8x256xf32> to vector<8x256xf32>
    %c0_2 = arith.constant 0 : index
    %c0_3 = arith.constant 0 : index
    %2 = vector.load %arg2[%c0_2, %c0_3] : memref<8x1xf32, #tpu.memory_space<vmem>>, vector<8x1xf32>
    %3 = vector.broadcast %2 : vector<8x1xf32> to vector<8x256xf32>
    %4 = arith.mulf %1, %3 : vector<8x256xf32>
    %c0_4 = arith.constant 0 : index
    %c0_5 = arith.constant 0 : index
    %5 = vector.load %arg3[%c0_4, %c0_5] : memref<8x1xf32, #tpu.memory_space<vmem>>, vector<8x1xf32>
    %6 = vector.broadcast %5 : vector<8x1xf32> to vector<8x256xf32>
    %7 = arith.addf %4, %6 : vector<8x256xf32>
    %cst = arith.constant 0.000000e+00 : f32
    %8 = vector.broadcast %cst : f32 to vector<8x256xf32>
    %9 = arith.maximumf %7, %8 : vector<8x256xf32>
    %c0_6 = arith.constant 0 : index
    %c0_7 = arith.constant 0 : index
    %c0_8 = arith.constant 0 : index
    %10 = vector.load %arg4[%c0_6, %c0_7, %c0_8] : memref<1x8x256xf32, #tpu.memory_space<vmem>>, vector<1x8x256xf32>
    %11 = vector.shape_cast %10 : vector<1x8x256xf32> to vector<8x256xf32>
    %12 = vector.shape_cast %9 : vector<8x256xf32> to vector<1x8x256xf32>
    tpu.vector_store %arg4[%c0_6, %c0_7, %c0_8], %12 {strides = array<i32>} : memref<1x8x256xf32, #tpu.memory_space<vmem>>, vector<1x8x256xf32>,
    return
  }
  func.func @transform_0(%arg0: i32) -> (i32, i32, i32) {
    %c0_i32 = arith.constant 0 : i32
    %c0_i32_0 = arith.constant 0 : i32
    %c0_i32_1 = arith.constant 0 : i32
    return %arg0, %c0_i32, %c0_i32_0 : i32, i32, i32
  }
  func.func @transform_1(%arg0: i32) -> (i32, i32) {
    %c0_i32 = arith.constant 0 : i32
    %c0_i32_0 = arith.constant 0 : i32
    %c0_i32_1 = arith.constant 0 : i32
    return %c0_i32, %c0_i32_0 : i32, i32
  }
  func.func @transform_2(%arg0: i32) -> (i32, i32) {
    %c0_i32 = arith.constant 0 : i32
    %c0_i32_0 = arith.constant 0 : i32
    %c0_i32_1 = arith.constant 0 : i32
    return %c0_i32, %c0_i32_0 : i32, i32
  }
  func.func @transform_3(%arg0: i32) -> (i32, i32, i32) {
    %c0_i32 = arith.constant 0 : i32
    %c0_i32_0 = arith.constant 0 : i32
    %c0_i32_1 = arith.constant 0 : i32
    return %arg0, %c0_i32, %c0_i32_0 : i32, i32, i32
  }
}

module attributes {stable_mosaic.version = 11 : i64} {
  func.func @_conv3x3_kernel(%arg0: i32, %arg1: memref<1x8x256xf32, #tpu.memory_space<vmem>>, %arg2: memref<8x1xf32, #tpu.memory_space<vmem>>, %arg3: memref<8x1xf32, #tpu.memory_space<vmem>>, %arg4: memref<9x8x8xf32, #tpu.memory_space<vmem>>, %arg5: memref<8x1xf32, #tpu.memory_space<vmem>>, %arg6: memref<1x8x256xf32, #tpu.memory_space<vmem>>, %arg7: memref<1x8x2xf32, #tpu.memory_space<vmem>>) attributes {dimension_semantics = [#tpu.dimension_semantics<parallel>], iteration_bounds = array<i64: 2>, scalar_prefetch = 0 : i64, scratch_operands = 0 : i64, tpu.core_type = #tpu.core_type<tc>, window_params = [{transform_indices = @transform_0, window_bounds = array<i64: 1, 8, 256>}, {pipeline_mode = #tpu.pipeline_mode<synchronous>, transform_indices = @transform_1, window_bounds = array<i64: 8, 1>}, {pipeline_mode = #tpu.pipeline_mode<synchronous>, transform_indices = @transform_2, window_bounds = array<i64: 8, 1>}, {pipeline_mode = #tpu.pipeline_mode<synchronous>, transform_indices = @transform_3, window_bounds = array<i64: 9, 8, 8>}, {pipeline_mode = #tpu.pipeline_mode<synchronous>, transform_indices = @transform_4, window_bounds = array<i64: 8, 1>}, {transform_indices = @transform_5, window_bounds = array<i64: 1, 8, 256>}, {transform_indices = @transform_6, window_bounds = array<i64: 1, 8, 2>}]} {
    %c0 = arith.constant 0 : index
    %c0_0 = arith.constant 0 : index
    %c0_1 = arith.constant 0 : index
    %0 = vector.load %arg1[%c0, %c0_0, %c0_1] : memref<1x8x256xf32, #tpu.memory_space<vmem>>, vector<1x8x256xf32>
    %1 = vector.shape_cast %0 : vector<1x8x256xf32> to vector<8x256xf32>
    %c0_2 = arith.constant 0 : index
    %c0_3 = arith.constant 0 : index
    %2 = vector.load %arg2[%c0_2, %c0_3] : memref<8x1xf32, #tpu.memory_space<vmem>>, vector<8x1xf32>
    %3 = vector.broadcast %2 : vector<8x1xf32> to vector<8x256xf32>
    %4 = arith.mulf %1, %3 : vector<8x256xf32>
    %c0_4 = arith.constant 0 : index
    %c0_5 = arith.constant 0 : index
    %5 = vector.load %arg3[%c0_4, %c0_5] : memref<8x1xf32, #tpu.memory_space<vmem>>, vector<8x1xf32>
    %6 = vector.broadcast %5 : vector<8x1xf32> to vector<8x256xf32>
    %7 = arith.addf %4, %6 : vector<8x256xf32>
    %cst = arith.constant 0.000000e+00 : f32
    %8 = vector.broadcast %cst : f32 to vector<8x256xf32>
    %9 = arith.maximumf %7, %8 : vector<8x256xf32>
    %cst_6 = arith.constant 0.000000e+00 : f32
    %10 = vector.broadcast %cst_6 : f32 to vector<8x17xf32>
    %11 = tpu.concatenate %10, %9, %10 in 1 : vector<8x17xf32>, vector<8x256xf32>, vector<8x17xf32> -> vector<8x290xf32>
    %12 = tpu.iota {dimensions = array<i32: 1>} : vector<1x256xi32>
    %c16_i32 = arith.constant 16 : i32
    %c0_i32 = arith.constant 0 : i32
    %13 = arith.cmpi eq, %c16_i32, %c0_i32 : i32
    %c1_i32 = arith.constant 1 : i32
    %14 = arith.select %13, %c1_i32, %c16_i32 : i32
    %15 = vector.broadcast %14 : i32 to vector<1x256xi32>
    %16 = arith.remsi %12, %15 : vector<1x256xi32>
    %c0_i32_7 = arith.constant 0 : i32
    %17 = vector.broadcast %c0_i32_7 : i32 to vector<1x256xi32>
    %18 = arith.cmpi ne, %16, %17 : vector<1x256xi32>
    %c0_i32_8 = arith.constant 0 : i32
    %19 = vector.broadcast %c0_i32_8 : i32 to vector<1x256xi32>
    %20 = arith.cmpi slt, %16, %19 : vector<1x256xi32>
    %c0_i32_9 = arith.constant 0 : i32
    %21 = arith.cmpi slt, %14, %c0_i32_9 : i32
    %22 = vector.broadcast %21 : i1 to vector<1x256xi1>
    %23 = vector.broadcast %22 : vector<1x256xi1> to vector<1x256xi1>
    %24 = arith.xori %20, %23 : vector<1x256xi1>
    %25 = arith.andi %24, %18 : vector<1x256xi1>
    %26 = vector.broadcast %14 : i32 to vector<1x256xi32>
    %27 = arith.addi %16, %26 : vector<1x256xi32>
    %28 = arith.select %25, %27, %16 : vector<1x256xi1>, vector<1x256xi32>
    %c1_i32_10 = arith.constant 1 : i32
    %29 = vector.broadcast %c1_i32_10 : i32 to vector<1x256xi32>
    %30 = arith.cmpi sge, %28, %29 : vector<1x256xi32>
    %c14_i32 = arith.constant 14 : i32
    %31 = vector.broadcast %c14_i32 : i32 to vector<1x256xi32>
    %32 = arith.cmpi sle, %28, %31 : vector<1x256xi32>
    %cst_11 = arith.constant 0.000000e+00 : f32
    %33 = vector.broadcast %cst_11 : f32 to vector<8x256xf32>
    %c0_12 = arith.constant 0 : index
    %c0_13 = arith.constant 0 : index
    %34 = vector.load %arg5[%c0_12, %c0_13] : memref<8x1xf32, #tpu.memory_space<vmem>>, vector<8x1xf32>
    %35 = vector.broadcast %34 : vector<8x1xf32> to vector<8x256xf32>
    %36 = arith.addf %33, %35 : vector<8x256xf32>
    %37 = vector.extract_strided_slice %11 {offsets = [0, 0], sizes = [8, 256], strides = [1, 1]} : vector<8x290xf32> to vector<8x256xf32>
    %cst_14 = arith.constant 0.000000e+00 : f32
    %38 = vector.shape_cast %30 : vector<1x256xi1> to vector<1x256xi1>
    %39 = vector.broadcast %38 : vector<1x256xi1> to vector<8x256xi1>
    %40 = vector.broadcast %cst_14 : f32 to vector<8x256xf32>
    %41 = arith.select %39, %37, %40 : vector<8x256xi1>, vector<8x256xf32>
    %c0_15 = arith.constant 0 : index
    %c0_16 = arith.constant 0 : index
    %c0_17 = arith.constant 0 : index
    %42 = vector.load %arg4[%c0_15, %c0_16, %c0_17] : memref<9x8x8xf32, #tpu.memory_space<vmem>>, vector<1x8x8xf32>
    %43 = vector.shape_cast %42 : vector<1x8x8xf32> to vector<8x8xf32>
    %cst_18 = arith.constant dense<0.000000e+00> : vector<8x256xf32>
    %44 = tpu.matmul %43, %41, %cst_18 {dimension_numbers = #tpu.dot_dimension_numbers<[1], [0], [0], [1], [0, 0, 1, 1], [], []>} : vector<8x8xf32>, vector<8x256xf32>, vector<8x256xf32> -> vector<8x256xf32>
    %45 = arith.addf %36, %44 : vector<8x256xf32>
    %46 = vector.extract_strided_slice %11 {offsets = [0, 1], sizes = [8, 256], strides = [1, 1]} : vector<8x290xf32> to vector<8x256xf32>
    %c1 = arith.constant 1 : index
    %c0_19 = arith.constant 0 : index
    %c0_20 = arith.constant 0 : index
    %47 = vector.load %arg4[%c1, %c0_19, %c0_20] : memref<9x8x8xf32, #tpu.memory_space<vmem>>, vector<1x8x8xf32>
    %48 = vector.shape_cast %47 : vector<1x8x8xf32> to vector<8x8xf32>
    %cst_21 = arith.constant dense<0.000000e+00> : vector<8x256xf32>
    %49 = tpu.matmul %48, %46, %cst_21 {dimension_numbers = #tpu.dot_dimension_numbers<[1], [0], [0], [1], [0, 0, 1, 1], [], []>} : vector<8x8xf32>, vector<8x256xf32>, vector<8x256xf32> -> vector<8x256xf32>
    %50 = arith.addf %45, %49 : vector<8x256xf32>
    %51 = vector.extract_strided_slice %11 {offsets = [0, 2], sizes = [8, 256], strides = [1, 1]} : vector<8x290xf32> to vector<8x256xf32>
    %cst_22 = arith.constant 0.000000e+00 : f32
    %52 = vector.shape_cast %32 : vector<1x256xi1> to vector<1x256xi1>
    %53 = vector.broadcast %52 : vector<1x256xi1> to vector<8x256xi1>
    %54 = vector.broadcast %cst_22 : f32 to vector<8x256xf32>
    %55 = arith.select %53, %51, %54 : vector<8x256xi1>, vector<8x256xf32>
    %c2 = arith.constant 2 : index
    %c0_23 = arith.constant 0 : index
    %c0_24 = arith.constant 0 : index
    %56 = vector.load %arg4[%c2, %c0_23, %c0_24] : memref<9x8x8xf32, #tpu.memory_space<vmem>>, vector<1x8x8xf32>
    %57 = vector.shape_cast %56 : vector<1x8x8xf32> to vector<8x8xf32>
    %cst_25 = arith.constant dense<0.000000e+00> : vector<8x256xf32>
    %58 = tpu.matmul %57, %55, %cst_25 {dimension_numbers = #tpu.dot_dimension_numbers<[1], [0], [0], [1], [0, 0, 1, 1], [], []>} : vector<8x8xf32>, vector<8x256xf32>, vector<8x256xf32> -> vector<8x256xf32>
    %59 = arith.addf %50, %58 : vector<8x256xf32>
    %60 = vector.extract_strided_slice %11 {offsets = [0, 16], sizes = [8, 256], strides = [1, 1]} : vector<8x290xf32> to vector<8x256xf32>
    %cst_26 = arith.constant 0.000000e+00 : f32
    %61 = vector.shape_cast %30 : vector<1x256xi1> to vector<1x256xi1>
    %62 = vector.broadcast %61 : vector<1x256xi1> to vector<8x256xi1>
    %63 = vector.broadcast %cst_26 : f32 to vector<8x256xf32>
    %64 = arith.select %62, %60, %63 : vector<8x256xi1>, vector<8x256xf32>
    %c3 = arith.constant 3 : index
    %c0_27 = arith.constant 0 : index
    %c0_28 = arith.constant 0 : index
    %65 = vector.load %arg4[%c3, %c0_27, %c0_28] : memref<9x8x8xf32, #tpu.memory_space<vmem>>, vector<1x8x8xf32>
    %66 = vector.shape_cast %65 : vector<1x8x8xf32> to vector<8x8xf32>
    %cst_29 = arith.constant dense<0.000000e+00> : vector<8x256xf32>
    %67 = tpu.matmul %66, %64, %cst_29 {dimension_numbers = #tpu.dot_dimension_numbers<[1], [0], [0], [1], [0, 0, 1, 1], [], []>} : vector<8x8xf32>, vector<8x256xf32>, vector<8x256xf32> -> vector<8x256xf32>
    %68 = arith.addf %59, %67 : vector<8x256xf32>
    %69 = vector.extract_strided_slice %11 {offsets = [0, 17], sizes = [8, 256], strides = [1, 1]} : vector<8x290xf32> to vector<8x256xf32>
    %c4 = arith.constant 4 : index
    %c0_30 = arith.constant 0 : index
    %c0_31 = arith.constant 0 : index
    %70 = vector.load %arg4[%c4, %c0_30, %c0_31] : memref<9x8x8xf32, #tpu.memory_space<vmem>>, vector<1x8x8xf32>
    %71 = vector.shape_cast %70 : vector<1x8x8xf32> to vector<8x8xf32>
    %cst_32 = arith.constant dense<0.000000e+00> : vector<8x256xf32>
    %72 = tpu.matmul %71, %69, %cst_32 {dimension_numbers = #tpu.dot_dimension_numbers<[1], [0], [0], [1], [0, 0, 1, 1], [], []>} : vector<8x8xf32>, vector<8x256xf32>, vector<8x256xf32> -> vector<8x256xf32>
    %73 = arith.addf %68, %72 : vector<8x256xf32>
    %74 = vector.extract_strided_slice %11 {offsets = [0, 18], sizes = [8, 256], strides = [1, 1]} : vector<8x290xf32> to vector<8x256xf32>
    %cst_33 = arith.constant 0.000000e+00 : f32
    %75 = vector.shape_cast %32 : vector<1x256xi1> to vector<1x256xi1>
    %76 = vector.broadcast %75 : vector<1x256xi1> to vector<8x256xi1>
    %77 = vector.broadcast %cst_33 : f32 to vector<8x256xf32>
    %78 = arith.select %76, %74, %77 : vector<8x256xi1>, vector<8x256xf32>
    %c5 = arith.constant 5 : index
    %c0_34 = arith.constant 0 : index
    %c0_35 = arith.constant 0 : index
    %79 = vector.load %arg4[%c5, %c0_34, %c0_35] : memref<9x8x8xf32, #tpu.memory_space<vmem>>, vector<1x8x8xf32>
    %80 = vector.shape_cast %79 : vector<1x8x8xf32> to vector<8x8xf32>
    %cst_36 = arith.constant dense<0.000000e+00> : vector<8x256xf32>
    %81 = tpu.matmul %80, %78, %cst_36 {dimension_numbers = #tpu.dot_dimension_numbers<[1], [0], [0], [1], [0, 0, 1, 1], [], []>} : vector<8x8xf32>, vector<8x256xf32>, vector<8x256xf32> -> vector<8x256xf32>
    %82 = arith.addf %73, %81 : vector<8x256xf32>
    %83 = vector.extract_strided_slice %11 {offsets = [0, 32], sizes = [8, 256], strides = [1, 1]} : vector<8x290xf32> to vector<8x256xf32>
    %cst_37 = arith.constant 0.000000e+00 : f32
    %84 = vector.shape_cast %30 : vector<1x256xi1> to vector<1x256xi1>
    %85 = vector.broadcast %84 : vector<1x256xi1> to vector<8x256xi1>
    %86 = vector.broadcast %cst_37 : f32 to vector<8x256xf32>
    %87 = arith.select %85, %83, %86 : vector<8x256xi1>, vector<8x256xf32>
    %c6 = arith.constant 6 : index
    %c0_38 = arith.constant 0 : index
    %c0_39 = arith.constant 0 : index
    %88 = vector.load %arg4[%c6, %c0_38, %c0_39] : memref<9x8x8xf32, #tpu.memory_space<vmem>>, vector<1x8x8xf32>
    %89 = vector.shape_cast %88 : vector<1x8x8xf32> to vector<8x8xf32>
    %cst_40 = arith.constant dense<0.000000e+00> : vector<8x256xf32>
    %90 = tpu.matmul %89, %87, %cst_40 {dimension_numbers = #tpu.dot_dimension_numbers<[1], [0], [0], [1], [0, 0, 1, 1], [], []>} : vector<8x8xf32>, vector<8x256xf32>, vector<8x256xf32> -> vector<8x256xf32>
    %91 = arith.addf %82, %90 : vector<8x256xf32>
    %92 = vector.extract_strided_slice %11 {offsets = [0, 33], sizes = [8, 256], strides = [1, 1]} : vector<8x290xf32> to vector<8x256xf32>
    %c7 = arith.constant 7 : index
    %c0_41 = arith.constant 0 : index
    %c0_42 = arith.constant 0 : index
    %93 = vector.load %arg4[%c7, %c0_41, %c0_42] : memref<9x8x8xf32, #tpu.memory_space<vmem>>, vector<1x8x8xf32>
    %94 = vector.shape_cast %93 : vector<1x8x8xf32> to vector<8x8xf32>
    %cst_43 = arith.constant dense<0.000000e+00> : vector<8x256xf32>
    %95 = tpu.matmul %94, %92, %cst_43 {dimension_numbers = #tpu.dot_dimension_numbers<[1], [0], [0], [1], [0, 0, 1, 1], [], []>} : vector<8x8xf32>, vector<8x256xf32>, vector<8x256xf32> -> vector<8x256xf32>
    %96 = arith.addf %91, %95 : vector<8x256xf32>
    %97 = vector.extract_strided_slice %11 {offsets = [0, 34], sizes = [8, 256], strides = [1, 1]} : vector<8x290xf32> to vector<8x256xf32>
    %cst_44 = arith.constant 0.000000e+00 : f32
    %98 = vector.shape_cast %32 : vector<1x256xi1> to vector<1x256xi1>
    %99 = vector.broadcast %98 : vector<1x256xi1> to vector<8x256xi1>
    %100 = vector.broadcast %cst_44 : f32 to vector<8x256xf32>
    %101 = arith.select %99, %97, %100 : vector<8x256xi1>, vector<8x256xf32>
    %c8 = arith.constant 8 : index
    %c0_45 = arith.constant 0 : index
    %c0_46 = arith.constant 0 : index
    %102 = vector.load %arg4[%c8, %c0_45, %c0_46] : memref<9x8x8xf32, #tpu.memory_space<vmem>>, vector<1x8x8xf32>
    %103 = vector.shape_cast %102 : vector<1x8x8xf32> to vector<8x8xf32>
    %cst_47 = arith.constant dense<0.000000e+00> : vector<8x256xf32>
    %104 = tpu.matmul %103, %101, %cst_47 {dimension_numbers = #tpu.dot_dimension_numbers<[1], [0], [0], [1], [0, 0, 1, 1], [], []>} : vector<8x8xf32>, vector<8x256xf32>, vector<8x256xf32> -> vector<8x256xf32>
    %105 = arith.addf %96, %104 : vector<8x256xf32>
    %c0_48 = arith.constant 0 : index
    %c0_49 = arith.constant 0 : index
    %c0_50 = arith.constant 0 : index
    %106 = vector.load %arg6[%c0_48, %c0_49, %c0_50] : memref<1x8x256xf32, #tpu.memory_space<vmem>>, vector<1x8x256xf32>
    %107 = vector.shape_cast %106 : vector<1x8x256xf32> to vector<8x256xf32>
    %108 = vector.shape_cast %105 : vector<8x256xf32> to vector<1x8x256xf32>
    tpu.vector_store %arg6[%c0_48, %c0_49, %c0_50], %108 {strides = array<i32>} : memref<1x8x256xf32, #tpu.memory_space<vmem>>, vector<1x8x256xf32>,
    %cst_51 = arith.constant dense<0.000000e+00> : vector<8xf32>
    %109 = vector.multi_reduction <add>, %105, %cst_51 [1] : vector<8x256xf32> to vector<8xf32>
    %110 = vector.shape_cast %109 : vector<8xf32> to vector<8x1xf32>
    %111 = arith.mulf %105, %105 : vector<8x256xf32>
    %cst_52 = arith.constant dense<0.000000e+00> : vector<8xf32>
    %112 = vector.multi_reduction <add>, %111, %cst_52 [1] : vector<8x256xf32> to vector<8xf32>
    %113 = vector.shape_cast %112 : vector<8xf32> to vector<8x1xf32>
    %114 = tpu.concatenate %110, %113 in 1 : vector<8x1xf32>, vector<8x1xf32> -> vector<8x2xf32>
    %c0_53 = arith.constant 0 : index
    %c0_54 = arith.constant 0 : index
    %c0_55 = arith.constant 0 : index
    %115 = vector.load %arg7[%c0_53, %c0_54, %c0_55] : memref<1x8x2xf32, #tpu.memory_space<vmem>>, vector<1x8x2xf32>
    %116 = vector.shape_cast %115 : vector<1x8x2xf32> to vector<8x2xf32>
    %117 = vector.shape_cast %114 : vector<8x2xf32> to vector<1x8x2xf32>
    tpu.vector_store %arg7[%c0_53, %c0_54, %c0_55], %117 {strides = array<i32>} : memref<1x8x2xf32, #tpu.memory_space<vmem>>, vector<1x8x2xf32>,
    return
  }
  func.func @transform_0(%arg0: i32) -> (i32, i32, i32) {
    %c0_i32 = arith.constant 0 : i32
    %c0_i32_0 = arith.constant 0 : i32
    %c0_i32_1 = arith.constant 0 : i32
    return %arg0, %c0_i32, %c0_i32_0 : i32, i32, i32
  }
  func.func @transform_1(%arg0: i32) -> (i32, i32) {
    %c0_i32 = arith.constant 0 : i32
    %c0_i32_0 = arith.constant 0 : i32
    %c0_i32_1 = arith.constant 0 : i32
    return %c0_i32, %c0_i32_0 : i32, i32
  }
  func.func @transform_2(%arg0: i32) -> (i32, i32) {
    %c0_i32 = arith.constant 0 : i32
    %c0_i32_0 = arith.constant 0 : i32
    %c0_i32_1 = arith.constant 0 : i32
    return %c0_i32, %c0_i32_0 : i32, i32
  }
  func.func @transform_3(%arg0: i32) -> (i32, i32, i32) {
    %c0_i32 = arith.constant 0 : i32
    %c0_i32_0 = arith.constant 0 : i32
    %c0_i32_1 = arith.constant 0 : i32
    %c0_i32_2 = arith.constant 0 : i32
    return %c0_i32, %c0_i32_0, %c0_i32_1 : i32, i32, i32
  }
  func.func @transform_4(%arg0: i32) -> (i32, i32) {
    %c0_i32 = arith.constant 0 : i32
    %c0_i32_0 = arith.constant 0 : i32
    %c0_i32_1 = arith.constant 0 : i32
    return %c0_i32, %c0_i32_0 : i32, i32
  }
  func.func @transform_5(%arg0: i32) -> (i32, i32, i32) {
    %c0_i32 = arith.constant 0 : i32
    %c0_i32_0 = arith.constant 0 : i32
    %c0_i32_1 = arith.constant 0 : i32
    return %arg0, %c0_i32, %c0_i32_0 : i32, i32, i32
  }
  func.func @transform_6(%arg0: i32) -> (i32, i32, i32) {
    %c0_i32 = arith.constant 0 : i32
    %c0_i32_0 = arith.constant 0 : i32
    %c0_i32_1 = arith.constant 0 : i32
    return %arg0, %c0_i32, %c0_i32_0 : i32, i32, i32
  }
}

</mosaic_0001>

<bundles_post_ra>
// kernel: double_conv_forward.5
= control target key start
LH: loop header
LB: loop body
LE: loop exit
PB: predicated region body
PF: predicated region fallthrough
CT: control target
= control target key end

     0   :  { %s300_s12 = smov 0   ;;  %s323_s0 = inlined_call_operand.vmem [shape: f32[2,8,256], index: 0, kind: input, shape index: {}]   ;;  %s324_s1 = inlined_call_operand.vmem [shape: f32[8,1], index: 1, kind: input, shape index: {}]   ;;  %s325_s2 = inlined_call_operand.vmem [shape: f32[8,1], index: 2, kind: input, shape index: {}]   ;;  %s326_s3 = inlined_call_operand.vmem [shape: f32[2,8,256], index: 3, kind: output, shape index: {}]  }
   0x1 LB: > { %s248_s13 = sadd.s32 4294967295, %s277_s12   ;;  %p252_p0 = scmp.ge.s32.totalorder %s277_s12, 1  ;;  %s277_s12 = sphi %s300_s12, %s13_s12  }
   0x2   : > { %p137_p1 = scmp.lt.s32.totalorder %s277_s12, 3 }
   0x4   : > { %p138_p2 = pnand %p252_p0, %p137_p1 }
   0x5   : > { %p161_p3 = scmp.lt.s32.totalorder (!%p138_p2), %s248_s13, 1 }
   0x6   : > { %141 = sbr.rel (%p138_p2) target bundleno = 142 (0x8e), region = 32 }
   0xb   : > { %v173_v0 = vld [vmem:[%s324_s1] sm:$0xff]  ;;  %v279_v1 = vmov 0   ;;  %s328_s13 = smov (!%p161_p3, %s248_s13), 1 }
   0xc   : > { %270 = vset.pattern.permute.xlu0 %v279_v1  ;;  %v181_v2 = vld [vmem:[%s325_s2] sm:$0xff]  ;;  %s259_s18 = sshll.u32 %s328_s13, 4 }
   0xd   : > { %176 = vperm.xlu0 %270, %v173_v0   ;;  %s165_s21 = scalar_lea.vmem %s323_s0, %s259_s18  ;;  %s170_s24 = scalar_lea.vmem %s326_s3, %s259_s18 }
   0xe   : > { %v171_v4 = vld [vmem:[%s165_s21] sm:$0xff]  ;;  %v172_v5 = vld [vmem:[%s165_s21 + $0x8] sm:$0xff] }
  0x15   : > { %184 = vperm.xlu0 %270, %v181_v2  }
  0x7f   : > { %v177_v3 = vpop.permute.xlu0 %176 }
  0x80   : > { %v179_v6 = vmul.f32 %v177_v3, %v171_v4  ;;  %v180_v7 = vmul.f32 %v177_v3, %v172_v5 }
  0x87   : > { %v185_v8 = vpop.permute.xlu0 %184 }
  0x88   : > { %v187_v9 = vadd.f32 %v185_v8, %v179_v6  ;;  %v188_v10 = vadd.f32 %v185_v8, %v180_v7 }
  0x8a   : > { %v189_v11 = vmax.f32 %v187_v9, 0.0  ;;  %v190_v12 = vmax.f32 %v188_v10, 0.0 }
  0x8c   : > { %191 = vst [vmem:[%s170_s24] sm:$0xff] %v189_v11 }
  0x8d   : > { %192 = vst [vmem:[%s170_s24 + $0x8] sm:$0xff] %v190_v12 }
  0x8e PF: > { %s13_s12 = sadd.s32 1, %s277_s12  }
  0x8f   : > { %p10_p4 = scmp.ge.s32.totalorder %s13_s12, 4  }
  0x91   :  { %12 = sbr.rel (!%p10_p4) target bundleno = 1 (0x1), region = 62 }

// kernel: double_conv_forward.4
= control target key start
LH: loop header
LB: loop body
LE: loop exit
PB: predicated region body
PF: predicated region fallthrough
CT: control target
= control target key end

     0   :  { %s1107_s21 = smov 0   ;;  %s1246_s0 = inlined_call_operand.vmem [shape: f32[2,8,256], index: 0, kind: input, shape index: {}]   ;;  %s1247_s1 = inlined_call_operand.vmem [shape: f32[8,1], index: 1, kind: input, shape index: {}]   ;;  %s1248_s2 = inlined_call_operand.vmem [shape: f32[8,1], index: 2, kind: input, shape index: {}]   ;;  %s1249_s3 = inlined_call_operand.vmem [shape: f32[9,8,8], index: 3, kind: input, shape index: {}]   ;;  %s1250_s4 = inlined_call_operand.vmem [shape: f32[8,1], index: 4, kind: input, shape index: {}]   ;;  %s1251_s5 = inlined_call_operand.vmem [shape: f32[2,8,256], index: 5, kind: output, shape index: {0}]   ;;  %s1252_s6 = inlined_call_operand.vmem [shape: f32[2,8,2], index: 6, kind: output, shape index: {1}]  }
   0x1 LB: > { %s967_s22 = sadd.s32 4294967295, %s1060_s21   ;;  %p971_p0 = scmp.ge.s32.totalorder %s1060_s21, 1  ;;  %s1060_s21 = sphi %s1107_s21, %s17_s21  }
   0x2   : > { %p215_p1 = scmp.lt.s32.totalorder %s1060_s21, 3 }
   0x4   : > { %p216_p2 = pnand %p971_p0, %p215_p1 }
   0x5   : > { %p249_p3 = scmp.lt.s32.totalorder (!%p216_p2), %s967_s22, 1  ;;  %s1063_s7 = smov (!%p216_p2), 17  }
   0x6   : > { %219 = sbr.rel (%p216_p2) target bundleno = 671 (0x29f), region = 40  ;;  %s1064_s8 = smov (!%p216_p2), 126  }
   0x7   : > { %s1065_s9 = smov (!%p216_p2), 112   ;;  %s1066_s10 = smov (!%p216_p2), 127  }
   0x8   : > { %s1067_s11 = smov (!%p216_p2), 111   ;;  %s1068_s12 = smov (!%p216_p2), 110  }
   0x9   : > { %s1069_s13 = smov (!%p216_p2), 96   ;;  %s1070_s14 = smov (!%p216_p2), 95  }
   0xa   : > { %s1071_s15 = smov (!%p216_p2), 94  }
   0xb   : > { %v265_v0 = vld [vmem:[%s1247_s1] sm:$0xff]  ;;  %v1062_v1 = vmov 0   ;;  %s1262_s22 = smov (!%p249_p3, %s967_s22), 1  ;;  %v296_v13 = vlaneseq  ;;  %vm289_vm0 = vcmask 138240   ;;  %vm341_vm3 = vcmask 64512   ;;  %v981_v30 = vld [vmem:[%s1249_s3 + $0x8] sm:$0xff] }
   0xc   : > { %1037 = vset.pattern.permute.xlu0 %v1062_v1  ;;  %1053 = vset.pattern.permute.xlu1 %v1062_v1  ;;  %v273_v2 = vld [vmem:[%s1248_s2] sm:$0xff]  ;;  %s1017_s27 = sshll.u32 %s1262_s22, 4  ;;  %vm397_vm4 = vcmask 1039360   ;;  %vm457_vm5 = vcmask 1031168   ;;  %v984_v41 = vld [vmem:[%s1249_s3 + $0x10] sm:$0xff]  ;;  %vm517_vm8 = vcmask 916480  }
   0xd   : > { %268 = vperm.xlu0 %1037, %v265_v0   ;;  %s253_s30 = scalar_lea.vmem %s1246_s0, %s1017_s27  ;;  %v1129_v14 = vand.u32 127, %v296_v13  ;;  %v340_v26 = vld [vmem:[%s1249_s3] sm:$0xff]  ;;  %vm579_vm9 = vcmask 908288   ;;  %v989_v47 = vld [vmem:[%s1249_s3 + $0x18] sm:$0xff]  ;;  %vm635_vm10 = vcmask 900096   ;;  %v997_v57 = vld [vmem:[%s1249_s3 + $0x28] sm:$0xff]  ;;  %s258_s17 = scalar_lea.vmem %s1251_s5, %s1017_s27 }
   0xe   : > { %v263_v4 = vld [vmem:[%s253_s30] sm:$0xff]  ;;  %v264_v8 = vld [vmem:[%s253_s30 + $0x8] sm:$0xff]  ;;  %vm695_vm11 = vcmask 785408   ;;  %v1002_v63 = vld [vmem:[%s1249_s3 + $0x30] sm:$0xff]  ;;  %vm757_vm12 = vcmask 777216   ;;  %vm813_vm13 = vcmask 769024  }
   0xf   : > { %v303_v15 = vand.u32 15, %v1129_v14  ;;  %v298_v18 = vadd.s32 128, %v1129_v14  ;;  %v327_v34 = vld [vmem:[%s1250_s4] sm:$0xff]  ;;  %s976_s18 = sshll.u32 %s1262_s22, 3  ;;  %vm877_vm14 = vcmask 7168   ;;  %vm879_vm15 = vcmask 15360  }
  0x10   : > { %v994_v53 = vld [vmem:[%s1249_s3 + $0x20] sm:$0xff]  ;;  %s262_s23 = scalar_lea.vmem %s1252_s6, %s976_s18 }
  0x11   : > { %vm1134_vm1 = vcmp.ge.s32.totalorder %v303_v15, 1  ;;  %v310_v20 = vand.u32 15, %v298_v18  ;;  %vm1165_vm6 = vcmp.le.s32.totalorder %v303_v15, 14  ;;  %v1010_v14 = vld [vmem:[%s1249_s3 + $0x40] sm:$0xff] }
  0x13   : > { %vm1142_vm2 = vcmp.ge.s32.totalorder %v310_v20, 1  ;;  %vm1169_vm7 = vcmp.le.s32.totalorder %v310_v20, 14 }
  0x15   : > { %276 = vperm.xlu0 %1037, %v273_v2  }
  0x7f   : > { %v269_v3 = vpop.permute.xlu0 %268 }
  0x80   : > { %v271_v5 = vmul.f32 %v269_v3, %v263_v4  ;;  %v272_v10 = vmul.f32 %v269_v3, %v264_v8 }
  0x87   : > { %v277_v6 = vpop.permute.xlu0 %276 }
  0x88   : > { %v279_v7 = vadd.f32 %v277_v6, %v271_v5  ;;  %v280_v11 = vadd.f32 %v277_v6, %v272_v10  ;;  %v1007_v5 = vld [vmem:[%s1249_s3 + $0x38] sm:$0xff] }
  0x8a   : > { %v281_v9 = vmax.f32 %v279_v7, 0.0  ;;  %v282_v12 = vmax.f32 %v280_v11, 0.0 }
  0x8c   : > { %285 = vrot.lane.b32.xlu1 %v281_v9, %s1063_s7 }
  0x94   : > { %287 = vrot.lane.b32.xlu1 %v282_v12, %s1063_s7 }
  0xfe   : > { %v286_v17 = vpop.permute.xlu1 %285 }
  0xff   : > { %v294_v19 = vsel %vm289_vm0, 0.0, %v286_v17 }
 0x100   : > { %451 = vrot.lane.b32.xlu0 %v294_v19, %s1064_s8  ;;  %977 = vmatpush.msk.msra.mxu0 %vm1134_vm1, %v294_v19 }
 0x101   : > { %978 = vmatmul.msk.f32.vlgmr.msra.gmra.mxu0 %vm341_vm3, %v340_v26 }
 0x106   : > { %v288_v21 = vpop.permute.xlu1 %287 }
 0x107   : > { %v290_v23 = vsel %vm289_vm0, %v286_v17, %v288_v21  ;;  %v295_v25 = vsel %vm289_vm0, %v288_v21, 0.0 }
 0x108   : > { %511 = vrot.lane.b32.xlu0 %v294_v19, %s1065_s9  ;;  %453 = vrot.lane.b32.xlu1 %v290_v23, %s1064_s8  ;;  %v1038_v24 = vpack.i.bf16 %v290_v23, %v294_v19 }
 0x109   : > { %979 = vmatpush.msk.msra.mxu1 %vm1142_vm2, %v290_v23 }
 0x10a   : > { %1039 = vrot.lane.b32.xlu2 %v1038_v24, %s1066_s10  ;;  %980 = vmatmul.msk.f32.vlgmr.msra.gmra.mxu1 %vm341_vm3, %v340_v26 }
 0x110   : > { %1044 = vrot.lane.b32.xlu0 %v1038_v24, %s1067_s11  ;;  %513 = vrot.lane.b32.xlu1 %v290_v23, %s1065_s9 }
 0x112   : > { %395 = vrot.lane.b32.xlu2 %v295_v25, %s1066_s10 }
 0x118   : > { %631 = vrot.lane.b32.xlu0 %v290_v23, %s1068_s12  ;;  %577 = vrot.lane.b32.xlu1 %v295_v25, %s1067_s11 }
 0x11a   : > { %455 = vrot.lane.b32.xlu2 %v295_v25, %s1064_s8 }
 0x120   : > { %691 = vrot.lane.b32.xlu0 %v290_v23, %s1069_s13  ;;  %633 = vrot.lane.b32.xlu1 %v295_v25, %s1068_s12 }
 0x122   : > { %515 = vrot.lane.b32.xlu2 %v295_v25, %s1065_s9 }
 0x128   : > { %755 = vrot.lane.b32.xlu0 %v295_v25, %s1070_s14  ;;  %693 = vrot.lane.b32.xlu1 %v295_v25, %s1069_s13 }
 0x12a   : > { %629 = vrot.lane.b32.xlu2 %v294_v19, %s1068_s12 }
 0x130   : > { %811 = vrot.lane.b32.xlu0 %v295_v25, %s1071_s15  ;;  %807 = vrot.lane.b32.xlu1 %v294_v19, %s1071_s15 }
 0x132   : > { %689 = vrot.lane.b32.xlu2 %v294_v19, %s1069_s13 }
 0x138   : > { %330 = vperm.xlu1 %1053, %v327_v34  }
 0x13a   : > { %1049 = vrot.lane.b32.xlu2 %v1038_v24, %s1070_s14 }
 0x142   : > { %809 = vrot.lane.b32.xlu2 %v290_v23, %s1071_s15 }
 0x164   : > { %v1040_v27 = vpop.permute.xlu2 %1039 }
 0x165   : > { %v1042_v28 = vunpack.i.h.bf16 %v1040_v27  ;;  %v1041_v29 = vunpack.i.l.bf16 %v1040_v27 }
 0x167   : > { %v398_v31 = vsel %vm397_vm4, %v1041_v29, %v1042_v28 }
 0x168   : > { %420 = vmatpush.msra.mxu2 %v398_v31 }
 0x169   : > { %982 = vmatmul.msk.f32.vlgmr.msra.gmra.mxu2 %vm341_vm3, %v981_v30 }
 0x16c   : > { %v396_v32 = vpop.permute.xlu2 %395 }
 0x16d   : > { %v399_v33 = vsel %vm397_vm4, %v1042_v28, %v396_v32 }
 0x16e   : > { %440 = vmatpush.msra.mxu3 %v399_v33 }
 0x16f   : > { %983 = vmatmul.msk.f32.vlgmr.msra.gmra.mxu3 %vm341_vm3, %v981_v30 }
 0x172   : > { %v452_v35 = vpop.permute.xlu0 %451 }
 0x174   : > { %v456_v36 = vpop.permute.xlu2 %455 }
 0x17a   : > { %v512_v39 = vpop.permute.xlu0 %511  ;;  %v454_v40 = vpop.permute.xlu1 %453 }
 0x17b   : > { %v458_v42 = vsel %vm457_vm5, %v452_v35, %v454_v40  ;;  %v459_v43 = vsel %vm457_vm5, %v454_v40, %v456_v36 }
 0x17c   : > { %985 = vmatpush.msk.msrb.mxu0 %vm1165_vm6, %v458_v42  ;;  %v516_v44 = vpop.permute.xlu2 %515  ;;  %987 = vmatpush.msk.msrb.mxu1 %vm1169_vm7, %v459_v43 }
 0x17d   : > { %986 = vmatmul.msk.f32.vlgmr.msrb.gmra.mxu0 %vm341_vm3, %v984_v41  ;;  %988 = vmatmul.msk.f32.vlgmr.msrb.gmra.mxu1 %vm341_vm3, %v984_v41 }
 0x17e   : > { %v362_v17 = vpop.f32.mrf.mxu0 }
 0x182   : > { %v1045_v45 = vpop.permute.xlu0 %1044  ;;  %v514_v46 = vpop.permute.xlu1 %513 }
 0x183   : > { %v1047_v48 = vunpack.i.h.bf16 %v1045_v45  ;;  %v1046_v49 = vunpack.i.l.bf16 %v1045_v45  ;;  %v518_v50 = vsel %vm517_vm8, %v512_v39, %v514_v46  ;;  %v519_v51 = vsel %vm517_vm8, %v514_v46, %v516_v44 }
 0x184   : > { %v630_v52 = vpop.permute.xlu2 %629  ;;  %990 = vmatpush.msk.msrb.mxu2 %vm1134_vm1, %v518_v50  ;;  %992 = vmatpush.msk.msrb.mxu3 %vm1142_vm2, %v519_v51 }
 0x185   : > { %v580_v54 = vsel %vm579_vm9, %v1046_v49, %v1047_v48  ;;  %991 = vmatmul.msk.f32.vlgmr.msrb.gmra.mxu2 %vm341_vm3, %v989_v47  ;;  %993 = vmatmul.msk.f32.vlgmr.msrb.gmra.mxu3 %vm341_vm3, %v989_v47 }
 0x186   : > { %602 = vmatpush.msra.mxu0 %v580_v54 }
 0x187   : > { %995 = vmatmul.msk.f32.vlgmr.msra.gmra.mxu0 %vm341_vm3, %v994_v53  ;;  %v382_v18 = vpop.f32.mrf.mxu1 }
 0x18a   : > { %v632_v55 = vpop.permute.xlu0 %631  ;;  %v578_v56 = vpop.permute.xlu1 %577 }
 0x18b   : > { %v636_v58 = vsel %vm635_vm10, %v630_v52, %v632_v55  ;;  %v581_v59 = vsel %vm579_vm9, %v1047_v48, %v578_v56 }
 0x18c   : > { %v690_v60 = vpop.permute.xlu2 %689  ;;  %622 = vmatpush.msra.mxu1 %v581_v59  ;;  %998 = vmatpush.msk.msra.mxu2 %vm1165_vm6, %v636_v58 }
 0x18d   : > { %999 = vmatmul.msk.f32.vlgmr.msra.gmra.mxu2 %vm341_vm3, %v997_v57  ;;  %996 = vmatmul.msk.f32.vlgmr.msra.gmra.mxu1 %vm341_vm3, %v994_v53 }
 0x192   : > { %v692_v61 = vpop.permute.xlu0 %691  ;;  %v634_v62 = vpop.permute.xlu1 %633 }
 0x193   : > { %v696_v0 = vsel %vm695_vm11, %v690_v60, %v692_v61  ;;  %v637_v1 = vsel %vm635_vm10, %v632_v55, %v634_v62 }
 0x194   : > { %1003 = vmatpush.msk.msrb.mxu0 %vm1134_vm1, %v696_v0  ;;  %v1050_v2 = vpop.permute.xlu2 %1049  ;;  %1000 = vmatpush.msk.msra.mxu3 %vm1169_vm7, %v637_v1 }
 0x195   : > { %v1052_v3 = vunpack.i.h.bf16 %v1050_v2  ;;  %v1051_v4 = vunpack.i.l.bf16 %v1050_v2  ;;  %1001 = vmatmul.msk.f32.vlgmr.msra.gmra.mxu3 %vm341_vm3, %v997_v57  ;;  %1004 = vmatmul.msk.f32.vlgmr.msrb.gmra.mxu0 %vm341_vm3, %v1002_v63 }
 0x197   : > { %v758_v6 = vsel %vm757_vm12, %v1051_v4, %v1052_v3 }
 0x198   : > { %780 = vmatpush.msrb.mxu2 %v758_v6 }
 0x199   : > { %1008 = vmatmul.msk.f32.vlgmr.msrb.gmra.mxu2 %vm341_vm3, %v1007_v5 }
 0x19a   : > { %v756_v7 = vpop.permute.xlu0 %755  ;;  %v694_v8 = vpop.permute.xlu1 %693 }
 0x19b   : > { %v759_v9 = vsel %vm757_vm12, %v1052_v3, %v756_v7  ;;  %v697_v10 = vsel %vm695_vm11, %v692_v61, %v694_v8 }
 0x19c   : > { %1005 = vmatpush.msk.msrb.mxu1 %vm1142_vm2, %v697_v10  ;;  %800 = vmatpush.msrb.mxu3 %v759_v9  ;;  %v810_v11 = vpop.permute.xlu2 %809 }
 0x19d   : > { %1006 = vmatmul.msk.f32.vlgmr.msrb.gmra.mxu1 %vm341_vm3, %v1002_v63  ;;  %1009 = vmatmul.msk.f32.vlgmr.msrb.gmra.mxu3 %vm341_vm3, %v1007_v5 }
 0x1a2   : > { %v812_v12 = vpop.permute.xlu0 %811  ;;  %v808_v13 = vpop.permute.xlu1 %807 }
 0x1a3   : > { %v815_v15 = vsel %vm813_vm13, %v810_v11, %v812_v12  ;;  %v814_v16 = vsel %vm813_vm13, %v808_v13, %v810_v11 }
 0x1a4   : > { %1011 = vmatpush.msk.msra.mxu0 %vm1165_vm6, %v814_v16  ;;  %1013 = vmatpush.msk.msra.mxu1 %vm1169_vm7, %v815_v15 }
 0x1a5   : > { %1012 = vmatmul.msk.f32.vlgmr.msra.gmra.mxu0 %vm341_vm3, %v1010_v14  ;;  %1014 = vmatmul.msk.f32.vlgmr.msra.gmra.mxu1 %vm341_vm3, %v1010_v14 }
 0x1aa   : > { %v331_v20 = vpop.permute.xlu1 %330 }
 0x1ab   : > { %v385_v24 = vadd.f32 %v362_v17, %v331_v20  ;;  %v386_v25 = vadd.f32 %v382_v18, %v331_v20 }
 0x1ec   : > { %v422_v19 = vpop.f32.mrf.mxu2 }
 0x1ed   : > { %v445_v27 = vadd.f32 %v422_v19, %v385_v24 }
 0x1f2   : > { %v442_v22 = vpop.f32.mrf.mxu3 }
 0x1f3   : > { %v446_v28 = vadd.f32 %v442_v22, %v386_v25 }
 0x1fa   : > { %v486_v21 = vpop.f32.mrf.mxu0  ;;  %v506_v23 = vpop.f32.mrf.mxu1 }
 0x1fb   : > { %v510_v31 = vadd.f32 %v506_v23, %v446_v28  ;;  %v509_v32 = vadd.f32 %v486_v21, %v445_v27 }
 0x204   : > { %v604_v29 = vpop.f32.mrf.mxu0 }
 0x208   : > { %v546_v26 = vpop.f32.mrf.mxu2  ;;  %v566_v30 = vpop.f32.mrf.mxu3 }
 0x209   : > { %v569_v34 = vadd.f32 %v546_v26, %v509_v32  ;;  %v570_v35 = vadd.f32 %v566_v30, %v510_v31 }
 0x20a   : > { %v624_v33 = vpop.f32.mrf.mxu1 }
 0x20b   : > { %v627_v38 = vadd.f32 %v604_v29, %v569_v34  ;;  %v628_v39 = vadd.f32 %v624_v33, %v570_v35 }
 0x210   : > { %v664_v36 = vpop.f32.mrf.mxu2 }
 0x211   : > { %v687_v42 = vadd.f32 %v664_v36, %v627_v38 }
 0x212   : > { %v724_v40 = vpop.f32.mrf.mxu0 }
 0x213   : > { %v747_v45 = vadd.f32 %v724_v40, %v687_v42 }
 0x218   : > { %v684_v37 = vpop.f32.mrf.mxu3 }
 0x219   : > { %v688_v43 = vadd.f32 %v684_v37, %v628_v39 }
 0x21a   : > { %v744_v41 = vpop.f32.mrf.mxu1 }
 0x21b   : > { %v748_v46 = vadd.f32 %v744_v41, %v688_v43 }
 0x21c   : > { %v782_v44 = vpop.f32.mrf.mxu2 }
 0x21d   : > { %v805_v48 = vadd.f32 %v782_v44, %v747_v45 }
 0x220   : > { %v802_v47 = vpop.f32.mrf.mxu3 }
 0x221   : > { %v806_v49 = vadd.f32 %v802_v47, %v748_v46 }
 0x222   : > { %v842_v50 = vpop.f32.mrf.mxu0  ;;  %v862_v51 = vpop.f32.mrf.mxu1 }
 0x223   : > { %v865_v52 = vadd.f32 %v842_v50, %v805_v48  ;;  %v866_v53 = vadd.f32 %v862_v51, %v806_v49 }
 0x225   : > { %867 = vst [vmem:[%s258_s17] sm:$0xff] %v865_v52  ;;  %v869_v54 = vadd.f32 %v866_v53, %v865_v52  ;;  %v872_v55 = vmul.f32 %v865_v52, %v865_v52  ;;  %v873_v56 = vmul.f32 %v866_v53, %v866_v53 }
 0x226   : > { %868 = vst [vmem:[%s258_s17 + $0x8] sm:$0xff] %v866_v53 }
 0x227   : > { %870 = vadd.xlane.f32.xlu2 %v869_v54  ;;  %v874_v57 = vadd.f32 %v873_v56, %v872_v55 }
 0x229   : > { %875 = vadd.xlane.f32.xlu0 %v874_v57 }
 0x29a   : > { %v871_v58 = vpop.xlane.xlu2 %870 }
 0x29c   : > { %v876_v59 = vpop.xlane.xlu0 %875 }
 0x29d   : > { %v878_v60 = vsel %vm877_vm14, %v871_v58, %v876_v59 }
 0x29e   : > { %880 = vst.msk [vmem:[%s262_s23] sm:$0xff] %vm879_vm15, %v878_v60 }
 0x29f PF: > { %s17_s21 = sadd.s32 1, %s1060_s21  }
 0x2a0   : > { %p14_p4 = scmp.ge.s32.totalorder %s17_s21, 4  }
 0x2a2   :  { %16 = sbr.rel (!%p14_p4) target bundleno = 1 (0x1), region = 90 }

// kernel: double_conv_forward.3
= control target key start
LH: loop header
LB: loop body
LE: loop exit
PB: predicated region body
PF: predicated region fallthrough
CT: control target
= control target key end

     0   :  { %s1124_s21 = smov 0   ;;  %s1277_s0 = inlined_call_operand.vmem [shape: f32[2,4,256], index: 0, kind: input, shape index: {}]   ;;  %s1278_s1 = inlined_call_operand.vmem [shape: f32[4,1], index: 1, kind: input, shape index: {}]   ;;  %s1279_s2 = inlined_call_operand.vmem [shape: f32[4,1], index: 2, kind: input, shape index: {}]   ;;  %s1280_s3 = inlined_call_operand.vmem [shape: f32[9,8,4], index: 3, kind: input, shape index: {}]   ;;  %s1281_s4 = inlined_call_operand.vmem [shape: f32[8,1], index: 4, kind: input, shape index: {}]   ;;  %s1282_s5 = inlined_call_operand.vmem [shape: f32[2,8,256], index: 5, kind: output, shape index: {0}]   ;;  %s1283_s6 = inlined_call_operand.vmem [shape: f32[2,8,2], index: 6, kind: output, shape index: {1}]  }
   0x1 LB: > { %s993_s1 = sadd.s32 4294967295, %s1077_s21   ;;  %p997_p0 = scmp.ge.s32.totalorder %s1077_s21, 1  ;;  %s1077_s21 = sphi %s1124_s21, %s17_s21  }
   0x2   : > { %p215_p1 = scmp.lt.s32.totalorder %s1077_s21, 3 }
   0x4   : > { %p216_p2 = pnand %p997_p0, %p215_p1 }
   0x5   : > { %p249_p3 = scmp.lt.s32.totalorder (!%p216_p2), %s993_s1, 1  ;;  %s1079_s25 = smov (!%p216_p2), 17  }
   0x6   : > { %219 = sbr.rel (%p216_p2) target bundleno = 572 (0x23c), region = 40  ;;  %s1080_s26 = smov (!%p216_p2), 127  }
   0x7   : > { %s1081_s27 = smov (!%p216_p2), 126   ;;  %s1082_s28 = smov (!%p216_p2), 112  }
   0x8   : > { %s1083_s29 = smov (!%p216_p2), 110   ;;  %s1084_s30 = smov (!%p216_p2), 111  }
   0x9   : > { %s1085_s7 = smov (!%p216_p2), 96   ;;  %s1086_s8 = smov (!%p216_p2), 95  }
   0xa   : > { %s1087_s9 = smov (!%p216_p2), 94  }
   0xb   : > { %s1293_s1 = smov (!%p249_p3, %s993_s1), 1  ;;  %v279_v3 = vlaneseq  ;;  %vm272_vm0 = vcmask 138240   ;;  %vm328_vm2 = vcmask 1043456   ;;  %vm324_vm4 = vcmask 31744   ;;  %v323_v18 = vld [vmem:[%s1280_s3] sm:$0xff]  ;;  %v1007_v26 = vld [vmem:[%s1280_s3 + $0x8] sm:$0xff] }
   0xc   : > { %s1049_s2 = sshll.u32 %s1293_s1, 3  ;;  %vm449_vm5 = vcmask 1031168   ;;  %vm387_vm6 = vcmask 1039360   ;;  %v1012_v30 = vld [vmem:[%s1280_s3 + $0x10] sm:$0xff]  ;;  %vm515_vm8 = vcmask 916480   ;;  %v1017_v36 = vld [vmem:[%s1280_s3 + $0x18] sm:$0xff] }
   0xd   : > { %s253_s24 = scalar_lea.vmem %s1277_s0, %s1049_s2  ;;  %v280_v4 = vand.u32 127, %v279_v3  ;;  %vm641_vm10 = vcmask 900096   ;;  %v1027_v43 = vld [vmem:[%s1280_s3 + $0x28] sm:$0xff]  ;;  %vm583_vm11 = vcmask 908288   ;;  %v1022_v49 = vld [vmem:[%s1280_s3 + $0x20] sm:$0xff]  ;;  %vm707_vm12 = vcmask 785408   ;;  %s262_s13 = scalar_lea.vmem %s1283_s6, %s1049_s2 }
   0xe   : > { %v263_v0 = vld [vmem:[%s253_s24] sm:$0xff]  ;;  %v1088_v56 = vmov 0   ;;  %v1032_v60 = vld [vmem:[%s1280_s3 + $0x30] sm:$0xff]  ;;  %vm775_vm13 = vcmask 777216   ;;  %vm833_vm14 = vcmask 769024   ;;  %vm903_vm15 = vcmask 7168  }
   0xf   : > { %265 = vst [vmem:[#allocation1] ss:$2 sm:$0xff] %v263_v0  ;;  %v286_v5 = vand.u32 15, %v280_v4  ;;  %v1144_v7 = vadd.s32 128, %v280_v4  ;;  %v310_v55 = vld [vmem:[%s1281_s4] sm:$0xff]  ;;  %1069 = vset.pattern.permute.xlu2 %v1088_v56  ;;  %1070 = vset.pattern.permute.xlu0 %v1088_v56 }
  0x11   : > { %vm1140_vm1 = vcmp.ge.s32.totalorder %v286_v5, 1  ;;  %v293_v11 = vand.u32 15, %v1144_v7  ;;  %vm1164_vm7 = vcmp.le.s32.totalorder %v286_v5, 14 }
  0x13   : > { %vm1152_vm3 = vcmp.ge.s32.totalorder %v293_v11, 1  ;;  %vm1185_vm9 = vcmp.le.s32.totalorder %v293_v11, 14 }
  0x16   : > { %v266_v1 = vld.sshfl [vmem:[#allocation1] sm:$0xff pattern:$0x75316420]  ;;  %v267_v2 = vld.sshfl [vmem:[#allocation1 + $0x8] sm:$0xff pattern:$0x75316420] }
  0x17   : > { %268 = vrot.lane.b32.xlu0 %v266_v1, %s1079_s25  ;;  %v1037_v1 = vld [vmem:[%s1280_s3 + $0x38] sm:$0xff] }
  0x1f   : > { %270 = vrot.lane.b32.xlu0 %v267_v2, %s1079_s25 }
  0x89   : > { %v269_v8 = vpop.permute.xlu0 %268 }
  0x8a   : > { %v277_v9 = vsel %vm272_vm0, 0.0, %v269_v8 }
  0x8b   : > { %381 = vrot.lane.b32.xlu1 %v277_v9, %s1080_s26  ;;  %v321_v10 = vsel %vm1140_vm1, %v277_v9, 0.0 }
  0x8c   : > { %1003 = vmatpush.msk.msra.mxu0 %vm328_vm2, %v321_v10  ;;  %v1042_v10 = vld [vmem:[%s1280_s3 + $0x40] sm:$0xff] }
  0x8d   : > { %1004 = vmatmul.msk.f32.vlgmr.msra.gmra.mxu0 %vm324_vm4, %v323_v18 }
  0x91   : > { %v271_v13 = vpop.permute.xlu0 %270 }
  0x92   : > { %v273_v14 = vsel %vm272_vm0, %v269_v8, %v271_v13  ;;  %v278_v15 = vsel %vm272_vm0, %v271_v13, 0.0  ;;  %vm905_vm0 = vcmask 15360  }
  0x93   : > { %385 = vrot.lane.b32.xlu2 %v278_v15, %s1080_s26  ;;  %445 = vrot.lane.b32.xlu0 %v273_v14, %s1081_s27  ;;  %v322_v16 = vsel %vm1152_vm3, %v273_v14, 0.0 }
  0x94   : > { %383 = vrot.lane.b32.xlu1 %v273_v14, %s1080_s26  ;;  %1005 = vmatpush.msk.msra.mxu1 %vm328_vm2, %v322_v16 }
  0x95   : > { %1006 = vmatmul.msk.f32.vlgmr.msra.gmra.mxu1 %vm324_vm4, %v323_v18 }
  0x9b   : > { %443 = vrot.lane.b32.xlu2 %v277_v9, %s1081_s27  ;;  %511 = vrot.lane.b32.xlu0 %v273_v14, %s1082_s28 }
  0x9c   : > { %447 = vrot.lane.b32.xlu1 %v278_v15, %s1081_s27 }
  0xa3   : > { %509 = vrot.lane.b32.xlu2 %v277_v9, %s1082_s28  ;;  %637 = vrot.lane.b32.xlu0 %v273_v14, %s1083_s29 }
  0xa4   : > { %513 = vrot.lane.b32.xlu1 %v278_v15, %s1082_s28 }
  0xab   : > { %635 = vrot.lane.b32.xlu2 %v277_v9, %s1083_s29  ;;  %579 = vrot.lane.b32.xlu0 %v273_v14, %s1084_s30 }
  0xac   : > { %639 = vrot.lane.b32.xlu1 %v278_v15, %s1083_s29 }
  0xb3   : > { %577 = vrot.lane.b32.xlu2 %v277_v9, %s1084_s30  ;;  %703 = vrot.lane.b32.xlu0 %v273_v14, %s1085_s7 }
  0xb4   : > { %581 = vrot.lane.b32.xlu1 %v278_v15, %s1084_s30 }
  0xbb   : > { %701 = vrot.lane.b32.xlu2 %v277_v9, %s1085_s7  ;;  %771 = vrot.lane.b32.xlu0 %v273_v14, %s1086_s8 }
  0xbc   : > { %705 = vrot.lane.b32.xlu1 %v278_v15, %s1085_s7  ;;  %s1050_s7 = sshll.u32 %s1293_s1, 4 }
  0xbd   : > { %s258_s10 = scalar_lea.vmem %s1282_s5, %s1050_s7 }
  0xc3   : > { %769 = vrot.lane.b32.xlu2 %v277_v9, %s1086_s8  ;;  %829 = vrot.lane.b32.xlu0 %v273_v14, %s1087_s9 }
  0xc4   : > { %773 = vrot.lane.b32.xlu1 %v278_v15, %s1086_s8 }
  0xcb   : > { %827 = vrot.lane.b32.xlu2 %v277_v9, %s1087_s9 }
  0xcc   : > { %831 = vrot.lane.b32.xlu1 %v278_v15, %s1087_s9 }
  0xd3   : > { %313 = vperm.xlu2 %1069, %v310_v55  }
  0xed   : > { %v386_v17 = vpop.permute.xlu2 %385 }
  0xf5   : > { %v444_v19 = vpop.permute.xlu2 %443 }
  0xfd   : > { %v382_v20 = vpop.permute.xlu1 %381  ;;  %v510_v21 = vpop.permute.xlu2 %509 }
 0x105   : > { %v446_v23 = vpop.permute.xlu0 %445  ;;  %v636_v31 = vpop.permute.xlu2 %635 }
 0x106   : > { %v450_v24 = vsel %vm449_vm5, %v444_v19, %v446_v23  ;;  %v384_v25 = vpop.permute.xlu1 %383 }
 0x107   : > { %v388_v27 = vsel %vm387_vm6, %v382_v20, %v384_v25  ;;  %v389_v28 = vsel %vm387_vm6, %v384_v25, %v386_v17  ;;  %v454_v29 = vsel %vm1164_vm7, %v450_v24, 0.0 }
 0x108   : > { %1008 = vmatpush.msk.msra.mxu2 %vm328_vm2, %v388_v27  ;;  %1010 = vmatpush.msk.msra.mxu3 %vm328_vm2, %v389_v28 }
 0x109   : > { %1013 = vmatpush.msk.msrb.mxu0 %vm328_vm2, %v454_v29  ;;  %1009 = vmatmul.msk.f32.vlgmr.msra.gmra.mxu2 %vm324_vm4, %v1007_v26 }
 0x10a   : > { %1011 = vmatmul.msk.f32.vlgmr.msra.gmra.mxu3 %vm324_vm4, %v1007_v26  ;;  %1014 = vmatmul.msk.f32.vlgmr.msrb.gmra.mxu0 %vm324_vm4, %v1012_v30  ;;  %v352_v16 = vpop.f32.mrf.mxu0 }
 0x10d   : > { %v512_v32 = vpop.permute.xlu0 %511  ;;  %v578_v44 = vpop.permute.xlu2 %577 }
 0x10e   : > { %v516_v34 = vsel %vm515_vm8, %v510_v21, %v512_v32  ;;  %v448_v35 = vpop.permute.xlu1 %447 }
 0x10f   : > { %v451_v37 = vsel %vm449_vm5, %v446_v23, %v448_v35  ;;  %v520_v38 = vsel %vm1140_vm1, %v516_v34, 0.0 }
 0x110   : > { %v455_v39 = vsel %vm1185_vm9, %v451_v37, 0.0  ;;  %1018 = vmatpush.msk.msrb.mxu2 %vm328_vm2, %v520_v38 }
 0x111   : > { %1015 = vmatpush.msk.msrb.mxu1 %vm328_vm2, %v455_v39  ;;  %1019 = vmatmul.msk.f32.vlgmr.msrb.gmra.mxu2 %vm324_vm4, %v1017_v36 }
 0x112   : > { %1016 = vmatmul.msk.f32.vlgmr.msrb.gmra.mxu1 %vm324_vm4, %v1012_v30  ;;  %v372_v19 = vpop.f32.mrf.mxu1 }
 0x115   : > { %v638_v40 = vpop.permute.xlu0 %637  ;;  %v702_v54 = vpop.permute.xlu2 %701 }
 0x116   : > { %v642_v41 = vsel %vm641_vm10, %v636_v31, %v638_v40  ;;  %v514_v42 = vpop.permute.xlu1 %513 }
 0x117   : > { %v646_v45 = vsel %vm1164_vm7, %v642_v41, 0.0  ;;  %v517_v46 = vsel %vm515_vm8, %v512_v32, %v514_v42 }
 0x118   : > { %v521_v47 = vsel %vm1152_vm3, %v517_v46, 0.0  ;;  %1028 = vmatpush.msk.msra.mxu2 %vm328_vm2, %v646_v45 }
 0x119   : > { %1020 = vmatpush.msk.msrb.mxu3 %vm328_vm2, %v521_v47  ;;  %1029 = vmatmul.msk.f32.vlgmr.msra.gmra.mxu2 %vm324_vm4, %v1027_v43 }
 0x11a   : > { %1021 = vmatmul.msk.f32.vlgmr.msrb.gmra.mxu3 %vm324_vm4, %v1017_v36 }
 0x11d   : > { %v580_v48 = vpop.permute.xlu0 %579  ;;  %v770_v63 = vpop.permute.xlu2 %769 }
 0x11e   : > { %v584_v50 = vsel %vm583_vm11, %v578_v44, %v580_v48  ;;  %v640_v51 = vpop.permute.xlu1 %639 }
 0x11f   : > { %v643_v52 = vsel %vm641_vm10, %v638_v40, %v640_v51  ;;  %1023 = vmatpush.msk.msra.mxu0 %vm328_vm2, %v584_v50 }
 0x120   : > { %v647_v53 = vsel %vm1185_vm9, %v643_v52, 0.0  ;;  %1024 = vmatmul.msk.f32.vlgmr.msra.gmra.mxu0 %vm324_vm4, %v1022_v49 }
 0x121   : > { %1030 = vmatpush.msk.msra.mxu3 %vm328_vm2, %v647_v53 }
 0x122   : > { %1031 = vmatmul.msk.f32.vlgmr.msra.gmra.mxu3 %vm324_vm4, %v1027_v43 }
 0x125   : > { %v704_v57 = vpop.permute.xlu0 %703  ;;  %v828_v6 = vpop.permute.xlu2 %827 }
 0x126   : > { %v708_v58 = vsel %vm707_vm12, %v702_v54, %v704_v57  ;;  %v582_v59 = vpop.permute.xlu1 %581 }
 0x127   : > { %v712_v61 = vsel %vm1140_vm1, %v708_v58, 0.0  ;;  %v585_v62 = vsel %vm583_vm11, %v580_v48, %v582_v59 }
 0x128   : > { %1025 = vmatpush.msk.msra.mxu1 %vm328_vm2, %v585_v62  ;;  %1033 = vmatpush.msk.msrb.mxu0 %vm328_vm2, %v712_v61 }
 0x129   : > { %1026 = vmatmul.msk.f32.vlgmr.msra.gmra.mxu1 %vm324_vm4, %v1022_v49  ;;  %1034 = vmatmul.msk.f32.vlgmr.msrb.gmra.mxu0 %vm324_vm4, %v1032_v60 }
 0x12d   : > { %v772_v0 = vpop.permute.xlu0 %771  ;;  %v314_v18 = vpop.permute.xlu2 %313 }
 0x12e   : > { %v776_v2 = vsel %vm775_vm13, %v770_v63, %v772_v0  ;;  %v706_v3 = vpop.permute.xlu1 %705  ;;  %v375_v21 = vadd.f32 %v352_v16, %v314_v18  ;;  %v376_v28 = vadd.f32 %v372_v19, %v314_v18 }
 0x12f   : > { %v709_v4 = vsel %vm707_vm12, %v704_v57, %v706_v3  ;;  %1038 = vmatpush.msk.msrb.mxu2 %vm328_vm2, %v776_v2 }
 0x130   : > { %v713_v5 = vsel %vm1152_vm3, %v709_v4, 0.0  ;;  %1039 = vmatmul.msk.f32.vlgmr.msrb.gmra.mxu2 %vm324_vm4, %v1037_v1 }
 0x131   : > { %1035 = vmatpush.msk.msrb.mxu1 %vm328_vm2, %v713_v5 }
 0x132   : > { %1036 = vmatmul.msk.f32.vlgmr.msrb.gmra.mxu1 %vm324_vm4, %v1032_v60 }
 0x135   : > { %v830_v7 = vpop.permute.xlu0 %829 }
 0x136   : > { %v834_v8 = vsel %vm833_vm14, %v828_v6, %v830_v7  ;;  %v774_v9 = vpop.permute.xlu1 %773 }
 0x137   : > { %v838_v11 = vsel %vm1164_vm7, %v834_v8, 0.0  ;;  %v777_v12 = vsel %vm775_vm13, %v772_v0, %v774_v9 }
 0x138   : > { %1040 = vmatpush.msk.msrb.mxu3 %vm328_vm2, %v777_v12  ;;  %1043 = vmatpush.msk.msra.mxu0 %vm328_vm2, %v838_v11 }
 0x139   : > { %1041 = vmatmul.msk.f32.vlgmr.msrb.gmra.mxu3 %vm324_vm4, %v1037_v1  ;;  %1044 = vmatmul.msk.f32.vlgmr.msra.gmra.mxu0 %vm324_vm4, %v1042_v10 }
 0x13e   : > { %v832_v13 = vpop.permute.xlu1 %831 }
 0x13f   : > { %v835_v14 = vsel %vm833_vm14, %v830_v7, %v832_v13 }
 0x140   : > { %v839_v15 = vsel %vm1185_vm9, %v835_v14, 0.0 }
 0x141   : > { %1045 = vmatpush.msk.msra.mxu1 %vm328_vm2, %v839_v15 }
 0x142   : > { %1046 = vmatmul.msk.f32.vlgmr.msra.gmra.mxu1 %vm324_vm4, %v1042_v10 }
 0x187   : > { %v484_v20 = vpop.f32.mrf.mxu0 }
 0x18c   : > { %v414_v17 = vpop.f32.mrf.mxu2 }
 0x18d   : > { %v437_v22 = vadd.f32 %v414_v17, %v375_v21  ;;  %v434_v23 = vpop.f32.mrf.mxu3 }
 0x18e   : > { %v438_v30 = vadd.f32 %v434_v23, %v376_v28 }
 0x18f   : > { %v507_v25 = vadd.f32 %v484_v20, %v437_v22  ;;  %v504_v26 = vpop.f32.mrf.mxu1 }
 0x190   : > { %v508_v34 = vadd.f32 %v504_v26, %v438_v30 }
 0x194   : > { %v550_v24 = vpop.f32.mrf.mxu2 }
 0x195   : > { %v573_v29 = vadd.f32 %v550_v24, %v507_v25 }
 0x19c   : > { %v676_v33 = vpop.f32.mrf.mxu2 }
 0x19d   : > { %v610_v27 = vpop.f32.mrf.mxu0  ;;  %v570_v32 = vpop.f32.mrf.mxu3 }
 0x19e   : > { %v633_v31 = vadd.f32 %v610_v27, %v573_v29  ;;  %v574_v38 = vadd.f32 %v570_v32, %v508_v34 }
 0x1a0   : > { %v699_v36 = vadd.f32 %v676_v33, %v633_v31 }
 0x1a5   : > { %v696_v41 = vpop.f32.mrf.mxu3 }
 0x1a6   : > { %v630_v35 = vpop.f32.mrf.mxu1  ;;  %v742_v37 = vpop.f32.mrf.mxu0 }
 0x1a7   : > { %v765_v39 = vadd.f32 %v742_v37, %v699_v36  ;;  %v634_v43 = vadd.f32 %v630_v35, %v574_v38 }
 0x1a9   : > { %v700_v47 = vadd.f32 %v696_v41, %v634_v43 }
 0x1af   : > { %v762_v45 = vpop.f32.mrf.mxu1 }
 0x1b0   : > { %v766_v48 = vadd.f32 %v762_v45, %v700_v47 }
 0x1b3   : > { %v802_v40 = vpop.f32.mrf.mxu2 }
 0x1b4   : > { %v825_v42 = vadd.f32 %v802_v40, %v765_v39 }
 0x1b6   : > { %v868_v44 = vpop.f32.mrf.mxu0 }
 0x1b7   : > { %v891_v46 = vadd.f32 %v868_v44, %v825_v42 }
 0x1b9   : > { %893 = vst [vmem:[%s258_s10] sm:$0xff] %v891_v46  ;;  %v898_v54 = vmul.f32 %v891_v46, %v891_v46 }
 0x1bc   : > { %v822_v49 = vpop.f32.mrf.mxu3 }
 0x1bd   : > { %v826_v50 = vadd.f32 %v822_v49, %v766_v48 }
 0x1bf   : > { %v888_v51 = vpop.f32.mrf.mxu1 }
 0x1c0   : > { %v892_v52 = vadd.f32 %v888_v51, %v826_v50 }
 0x1c2   : > { %894 = vst [vmem:[%s258_s10 + $0x8] sm:$0xff] %v892_v52  ;;  %v895_v53 = vadd.f32 %v892_v52, %v891_v46  ;;  %v899_v55 = vmul.f32 %v892_v52, %v892_v52 }
 0x1c4   : > { %896 = vadd.xlane.f32.xlu0 %v895_v53  ;;  %v900_v56 = vadd.f32 %v899_v55, %v898_v54 }
 0x1c6   : > { %901 = vadd.xlane.f32.xlu1 %v900_v56 }
 0x237   : > { %v897_v57 = vpop.xlane.xlu0 %896 }
 0x239   : > { %v902_v58 = vpop.xlane.xlu1 %901 }
 0x23a   : > { %v904_v59 = vsel %vm903_vm15, %v897_v57, %v902_v58 }
 0x23b   : > { %906 = vst.msk [vmem:[%s262_s13] sm:$0xff] %vm905_vm0, %v904_v59 }
 0x23c PF: > { %s17_s21 = sadd.s32 1, %s1077_s21  }
 0x23d   : > { %p14_p4 = scmp.ge.s32.totalorder %s17_s21, 4  }
 0x23f   :  { %16 = sbr.rel (!%p14_p4) target bundleno = 1 (0x1), region = 90 }

</bundles_post_ra>
